<compile_context>
chip_gen: v6e
topology: v6e:2x2x1
jax: 0.10.0
libtpu: 0.0.40
codegen_flags: <defaults>
</compile_context>

<pallas_src>
import functools

import jax
import jax.numpy as jnp
import numpy as np
from jax import lax
from jax.experimental import pallas as pl
from jax.experimental.pallas import tpu as pltpu


def _vq_kernel(x_ref, w_ref, wt_ref, w2_ref,
               q_ref, enc_ref, sqerr_ref, psum_ref, *, approx_recip):
    """One (batch, spatial-tile) step, channels-major layout.

    x_ref:     (1, D, T)  NCHW slab: all channels x T spatial positions
    w_ref:     (K, D)     codebook, f32 (logits matmul kept exact)
    wt_ref:    (D, K)     codebook transposed, MXU dtype (2nd matmul)
    w2_ref:    (K, 1)     precomputed ||w_k||^2, f32
    q_ref:     (1, D, T)  quantized output, same channels-major layout
    enc_ref:   (1, T, K)  soft encodings (pixels x codes)
    sqerr_ref: (1,1,1,1)  per-tile sum of (q - x)^2
    psum_ref:  (1,1,K,1)  per-tile sum of encodings over pixels
    """
    x = x_ref[0].astype(jnp.float32)          # (D, T)
    w = w_ref[...]                            # (K, D) f32
    wt = wt_ref[...]                          # (D, K) MXU dtype
    w2 = w2_ref[...]                          # (K, 1) f32

    # softmax(-d) is invariant to the per-pixel ||x||^2 term, so the logits
    # are simply 2<x_t, w_k> - ||w_k||^2.   f32 matmul -> exact logits.
    xw = lax.dot_general(w, x,
                         dimension_numbers=(((1,), (0,)), ((), ())),
                         preferred_element_type=jnp.float32)      # (K, T)
    logits = 2.0 * xw - w2                                        # (K, T)

    m = jnp.max(logits, axis=0, keepdims=True)                    # (1, T)
    e = jnp.exp(logits - m)
    denom = jnp.sum(e, axis=0, keepdims=True)                     # (1, T)
    enc = e * pl.reciprocal(denom, approx=approx_recip)           # (K, T) f32

    # quantized, channels-major: q = W^T @ enc  -> (D, T).   MXU (bf16 path:
    # enc is rounded to bf16 here, so rows no longer sum to *exactly* 1 — a
    # tiny systematic bias documented as acceptable under the bf16 tolerance.)
    q = lax.dot_general(wt, enc.astype(wt_ref.dtype),
                        dimension_numbers=(((1,), (0,)), ((), ())),
                        preferred_element_type=jnp.float32)       # (D, T)

    q_ref[0] = q.astype(q_ref.dtype)                              # lane-dense store
    enc_ref[0] = enc.T.astype(enc_ref.dtype)                      # (T, K), XLU transpose

    # Per-tile partial reductions (final cross-tile reduce in the wrapper,
    # keeping the grid fully parallel / megacore-friendly).
    diff = q - x
    d2 = diff * diff
    sq = jnp.sum(jnp.sum(d2, axis=1, keepdims=True), axis=0, keepdims=True)  # (1,1)
    sqerr_ref[...] = sq[None, None]                               # (1,1,1,1)
    psum_ref[...] = jnp.sum(enc, axis=1, keepdims=True)[None, None]  # (1,1,K,1)


def _pick_hw_tile(hw, cap, batch):
    """Largest spatial tile that is a multiple of 128 (or the full extent) and,
    when possible, leaves >= 2 total grid steps so both v7x TensorCores work."""
    if hw % 128 != 0:
        return hw                          # block dim must then equal the full dim
    cap = min(max(cap, 128), hw)
    cap -= cap % 128
    fallback = None
    t = cap
    while t >= 128:
        if hw % t == 0:
            if batch * (hw // t) >= 2:
                return t
            if fallback is None:
                fallback = t
        t -= 128
    return fallback if fallback is not None else hw


def vector_quantizer_forward(x_nchw, embedding_weight, commitment_cost, *,
                             hw_tile=2048,
                             matmul_dtype=jnp.bfloat16,
                             enc_dtype=jnp.bfloat16):
    """Forward pass of VectorQuantizer.

    Args:
      x_nchw: (B, C, H, W) input, C == embedding_dim.
      embedding_weight: (num_embeddings, embedding_dim) codebook.
      commitment_cost: beta.
      hw_tile: spatial positions per grid step (clamped / aligned internally).
      matmul_dtype: MXU dtype for the enc @ W matmul (bf16 default).
      enc_dtype: dtype of the returned encodings (bf16 default, f32 for exact).

    Returns: (loss, quantized_nchw, perplexity, encodings)
    """
    B, C, H, W = x_nchw.shape
    D = C
    K, D_w = embedding_weight.shape
    assert D_w == D, "channel dim must equal embedding_dim"
    HW = H * W
    N = B * HW

    # Keep NCHW: the kernel works on channels-major (B, D, HW) slabs and writes
    # quantized output in the same layout -> no wrapper transposes (2 fewer
    # full HBM passes).  Reshapes below are free (contiguous).
    x3 = x_nchw.reshape(B, D, HW)

    T = _pick_hw_tile(HW, hw_tile, B)
    n_hw = HW // T
    grid = (B, n_hw)
    n_steps = B * n_hw

    w_f32 = embedding_weight.astype(jnp.float32)           # (K, D) f32 logits matmul
    wt_mm = jnp.transpose(w_f32).astype(matmul_dtype)      # (D, K) 2nd matmul
    w2 = jnp.sum(w_f32 * w_f32, axis=1, keepdims=True)     # (K, 1) hoisted ||w||^2

    approx_recip = jnp.dtype(matmul_dtype) != jnp.dtype(jnp.float32)
    kernel = functools.partial(_vq_kernel, approx_recip=bool(approx_recip))

    q_dtype = x_nchw.dtype
    x_bytes = jnp.dtype(x_nchw.dtype).itemsize
    q_bytes = jnp.dtype(q_dtype).itemsize
    mm_bytes = jnp.dtype(matmul_dtype).itemsize
    enc_bytes = jnp.dtype(enc_dtype).itemsize

    # VMEM budget: double-buffered per-step blocks + f32 intermediates + margin,
    # capped at ~75% of this generation's physical VMEM (64 MiB v7x, 128 MiB
    # v5e/v6e); 48 MiB fallback is safe everywhere.
    per_step_io = (D * T * x_bytes + D * T * q_bytes + T * K * enc_bytes
                   + K * D * 4 + D * K * mm_bytes + K * 4 + (K + 1) * 4)
    intermediates = 5 * K * T * 4 + 3 * D * T * 4
    vmem_need = 2 * per_step_io + intermediates + (8 << 20)
    try:
        vmem_cap = int(pltpu.get_tpu_info().vmem_capacity_bytes * 3 // 4)
    except Exception:
        vmem_cap = 48 << 20
    vmem_limit = int(min(max(vmem_need, 32 << 20), vmem_cap))

    cost = pl.CostEstimate(
        flops=4 * N * K * D,                                # two matmuls
        transcendentals=N * K,                              # exp in the softmax
        bytes_accessed=(N * D * (x_bytes + q_bytes) + N * K * enc_bytes
                        + n_steps * (K * D * 4 + D * K * mm_bytes + K * 4)
                        + n_steps * (K + 2) * 4),
    )

    q3, enc3, sqerr_p, psum_p = pl.pallas_call(
        kernel,
        out_shape=(
            jax.ShapeDtypeStruct((B, D, HW), q_dtype),           # quantized (NCHW)
            jax.ShapeDtypeStruct((B, HW, K), enc_dtype),         # encodings
            jax.ShapeDtypeStruct((B, n_hw, 1, 1), jnp.float32),  # sqerr partials
            jax.ShapeDtypeStruct((B, n_hw, K, 1), jnp.float32),  # enc-sum partials
        ),
        grid_spec=pltpu.PrefetchScalarGridSpec(
            num_scalar_prefetch=0,
            grid=grid,
            in_specs=[
                pl.BlockSpec((1, D, T), lambda b, j: (b, 0, j)),  # input slab
                # TODO(synk): single-buffer the constant codebook blocks
                # (pipeline_mode=pl.Buffered(1)); saving is tiny at these sizes.
                pl.BlockSpec((K, D), lambda b, j: (0, 0)),        # codebook (f32)
                pl.BlockSpec((D, K), lambda b, j: (0, 0)),        # codebook^T (bf16)
                pl.BlockSpec((K, 1), lambda b, j: (0, 0)),        # ||w||^2
            ],
            out_specs=[
                pl.BlockSpec((1, D, T), lambda b, j: (b, 0, j)),
                pl.BlockSpec((1, T, K), lambda b, j: (b, j, 0)),
                pl.BlockSpec((1, 1, 1, 1), lambda b, j: (b, j, 0, 0)),
                pl.BlockSpec((1, 1, K, 1), lambda b, j: (b, j, 0, 0)),
            ],
        ),
        compiler_params=pltpu.CompilerParams(
            dimension_semantics=("parallel", "parallel"),   # no carries -> megacore OK
            vmem_limit_bytes=vmem_limit,
        ),
        cost_estimate=cost,
    )(x3, w_f32, wt_mm, w2)

    # Cheap final reductions of per-tile partials (plain-JAX glue).
    sqerr = jnp.sum(sqerr_p)
    psum = jnp.sum(psum_p, axis=(0, 1, 3))                 # (K,)

    mse = sqerr / (N * D)
    e_latent_loss = mse            # mean((q.detach() - x)^2): same forward value
    q_latent_loss = mse            # mean((q - x.detach())^2): same forward value
    loss = q_latent_loss + commitment_cost * e_latent_loss

    # straight-through estimator: forward value of (x + (q - x).detach()) == q
    quantized_nchw = q3.reshape(B, C, H, W)                # already channels-first
    encodings = enc3.reshape(N, K)

    avg_probs = psum / N
    perplexity = jnp.exp(-jnp.sum(avg_probs * jnp.log(avg_probs + 1e-10)))

    # TODO(synk): forward-only; no stop_gradient / custom_vjp, so jax.grad will
    # not reproduce the PyTorch module's straight-through gradients.
    return loss, quantized_nchw, perplexity, encodings


def _reference_forward(x_nchw, w, commitment_cost):
    """Pure-JAX f32 reference of the same forward (for correctness checks)."""
    B, C, H, W = x_nchw.shape
    x = jnp.transpose(x_nchw, (0, 2, 3, 1)).reshape(-1, C).astype(jnp.float32)
    d = (jnp.sum(x**2, axis=1, keepdims=True) + jnp.sum(w**2, axis=1)
         - 2.0 * x @ w.T)
    enc = jax.nn.softmax(-d, axis=1)
    q = enc @ w
    mse = jnp.mean((q - x) ** 2)
    loss = mse + commitment_cost * mse
    quant = jnp.transpose(q.reshape(B, H, W, C), (0, 3, 1, 2))
    avg = jnp.mean(enc, axis=0)
    ppl = jnp.exp(-jnp.sum(avg * jnp.log(avg + 1e-10)))
    return loss, quant, ppl, enc


if __name__ == "__main__":
    key = jax.random.PRNGKey(0)
    k_x, k_w = jax.random.split(key)

    # Small shapes consistent with the module: channels == embedding_dim.
    batch, embedding_dim, spatial = 2, 64, 16
    num_embeddings = 128
    commitment_cost = 0.25

    # input: NCHW, like the PyTorch module expects
    x = jax.random.normal(k_x, (batch, embedding_dim, spatial, spatial),
                          dtype=jnp.float32)

    # deterministic init matching nn.Embedding.weight.data.uniform_(-1/K, 1/K)
    embedding_weight = jax.random.uniform(
        k_w, (num_embeddings, embedding_dim), dtype=jnp.float32,
        minval=-1.0 / num_embeddings, maxval=1.0 / num_embeddings)

    loss_r, quant_r, ppl_r, enc_r = _reference_forward(x, embedding_weight,
                                                       commitment_cost)

    def _np32(a):
        return np.asarray(a).astype(np.float32)

    # 1) Default perf config: bf16 second matmul, bf16 encodings output.
    fwd = jax.jit(functools.partial(vector_quantizer_forward,
                                    commitment_cost=commitment_cost))
    loss, quantized, perplexity, encodings = fwd(x, embedding_weight)
    jax.block_until_ready((loss, quantized, perplexity, encodings))
    np.testing.assert_allclose(_np32(loss), _np32(loss_r), rtol=5e-2, atol=2e-3)
    np.testing.assert_allclose(_np32(quantized), _np32(quant_r), rtol=5e-2, atol=2e-3)
    np.testing.assert_allclose(_np32(perplexity), _np32(ppl_r), rtol=5e-2, atol=2e-3)
    np.testing.assert_allclose(_np32(encodings), _np32(enc_r), rtol=5e-2, atol=2e-3)

    # 2) Strict numerics config: f32 everywhere + multi-tile grid, tight tolerance.
    fwd32 = jax.jit(functools.partial(vector_quantizer_forward,
                                      commitment_cost=commitment_cost,
                                      hw_tile=128,
                                      matmul_dtype=jnp.float32,
                                      enc_dtype=jnp.float32))
    loss32, quant32, ppl32, enc32 = fwd32(x, embedding_weight)
    jax.block_until_ready((loss32, quant32, ppl32, enc32))
    np.testing.assert_allclose(_np32(loss32), _np32(loss_r), rtol=1e-5, atol=1e-5)
    np.testing.assert_allclose(_np32(quant32), _np32(quant_r), rtol=1e-5, atol=1e-5)
    np.testing.assert_allclose(_np32(ppl32), _np32(ppl_r), rtol=1e-5, atol=1e-5)
    np.testing.assert_allclose(_np32(enc32), _np32(enc_r), rtol=1e-5, atol=1e-5)

    print("KERNEL_OK")
</pallas_src>

<mosaic_0001>
module attributes {stable_mosaic.version = 11 : i64} {
  func.func @_vq_kernel(%arg0: i32, %arg1: i32, %arg2: memref<1x64x256xf32, #tpu.memory_space<vmem>>, %arg3: memref<128x64xf32, #tpu.memory_space<vmem>>, %arg4: memref<64x128xbf16, #tpu.memory_space<vmem>>, %arg5: memref<128x1xf32, #tpu.memory_space<vmem>>, %arg6: memref<1x64x256xf32, #tpu.memory_space<vmem>>, %arg7: memref<1x256x128xbf16, #tpu.memory_space<vmem>>, %arg8: memref<1x1x1x1xf32, #tpu.memory_space<vmem>>, %arg9: memref<1x1x128x1xf32, #tpu.memory_space<vmem>>) attributes {dimension_semantics = [#tpu.dimension_semantics<parallel>, #tpu.dimension_semantics<parallel>], iteration_bounds = array<i64: 2, 1>, scalar_prefetch = 0 : i64, scratch_operands = 0 : i64, tpu.core_type = #tpu.core_type<tc>, window_params = [{transform_indices = @transform_0, window_bounds = array<i64: 1, 64, 256>}, {pipeline_mode = #tpu.pipeline_mode<synchronous>, transform_indices = @transform_1, window_bounds = array<i64: 128, 64>}, {pipeline_mode = #tpu.pipeline_mode<synchronous>, transform_indices = @transform_2, window_bounds = array<i64: 64, 128>}, {pipeline_mode = #tpu.pipeline_mode<synchronous>, transform_indices = @transform_3, window_bounds = array<i64: 128, 1>}, {transform_indices = @transform_4, window_bounds = array<i64: 1, 64, 256>}, {transform_indices = @transform_5, window_bounds = array<i64: 1, 256, 128>}, {transform_indices = @transform_6, window_bounds = array<i64: 1, 1, 1, 1>}, {transform_indices = @transform_7, window_bounds = array<i64: 1, 1, 128, 1>}]} {
    %c0 = arith.constant 0 : index
    %c0_0 = arith.constant 0 : index
    %c0_1 = arith.constant 0 : index
    %0 = vector.load %arg2[%c0, %c0_0, %c0_1] : memref<1x64x256xf32, #tpu.memory_space<vmem>>, vector<1x64x256xf32>
    %1 = vector.shape_cast %0 : vector<1x64x256xf32> to vector<64x256xf32>
    %c0_2 = arith.constant 0 : index
    %c0_3 = arith.constant 0 : index
    %2 = vector.load %arg3[%c0_2, %c0_3] : memref<128x64xf32, #tpu.memory_space<vmem>>, vector<128x64xf32>
    %c0_4 = arith.constant 0 : index
    %c0_5 = arith.constant 0 : index
    %3 = vector.load %arg4[%c0_4, %c0_5] : memref<64x128xbf16, #tpu.memory_space<vmem>>, vector<64x128xbf16>
    %c0_6 = arith.constant 0 : index
    %c0_7 = arith.constant 0 : index
    %4 = vector.load %arg5[%c0_6, %c0_7] : memref<128x1xf32, #tpu.memory_space<vmem>>, vector<128x1xf32>
    %cst = arith.constant dense<0.000000e+00> : vector<128x256xf32>
    %5 = tpu.matmul %2, %1, %cst {dimension_numbers = #tpu.dot_dimension_numbers<[1], [0], [0], [1], [0, 0, 1, 1], [], []>} : vector<128x64xf32>, vector<64x256xf32>, vector<128x256xf32> -> vector<128x256xf32>
    %cst_8 = arith.constant 2.000000e+00 : f32
    %6 = vector.broadcast %cst_8 : f32 to vector<128x256xf32>
    %7 = arith.mulf %6, %5 : vector<128x256xf32>
    %8 = vector.broadcast %4 : vector<128x1xf32> to vector<128x256xf32>
    %9 = arith.subf %7, %8 : vector<128x256xf32>
    %cst_9 = arith.constant dense<0xFF800000> : vector<256xf32>
    %10 = vector.multi_reduction <maximumf>, %9, %cst_9 [0] : vector<128x256xf32> to vector<256xf32>
    %11 = vector.shape_cast %10 : vector<256xf32> to vector<1x256xf32>
    %12 = vector.broadcast %11 : vector<1x256xf32> to vector<128x256xf32>
    %13 = arith.subf %9, %12 : vector<128x256xf32>
    %14 = math.exp %13 : vector<128x256xf32>
    %cst_10 = arith.constant dense<0.000000e+00> : vector<256xf32>
    %15 = vector.multi_reduction <add>, %14, %cst_10 [0] : vector<128x256xf32> to vector<256xf32>
    %16 = vector.shape_cast %15 : vector<256xf32> to vector<1x256xf32>
    %17 = tpu.reciprocal %16 {approx = true} : vector<1x256xf32> -> vector<1x256xf32>
    %18 = vector.broadcast %17 : vector<1x256xf32> to vector<128x256xf32>
    %19 = arith.mulf %14, %18 : vector<128x256xf32>
    %20 = arith.truncf %19 : vector<128x256xf32> to vector<128x256xbf16>
    %cst_11 = arith.constant dense<0.000000e+00> : vector<64x256xf32>
    %21 = tpu.matmul %3, %20, %cst_11 {dimension_numbers = #tpu.dot_dimension_numbers<[1], [0], [0], [1], [0, 0, 1, 1], [], []>} : vector<64x128xbf16>, vector<128x256xbf16>, vector<64x256xf32> -> vector<64x256xf32>
    %c0_12 = arith.constant 0 : index
    %c0_13 = arith.constant 0 : index
    %c0_14 = arith.constant 0 : index
    %22 = vector.load %arg6[%c0_12, %c0_13, %c0_14] : memref<1x64x256xf32, #tpu.memory_space<vmem>>, vector<1x64x256xf32>
    %23 = vector.shape_cast %22 : vector<1x64x256xf32> to vector<64x256xf32>
    %24 = vector.shape_cast %21 : vector<64x256xf32> to vector<1x64x256xf32>
    tpu.vector_store %arg6[%c0_12, %c0_13, %c0_14], %24 {strides = array<i32>} : memref<1x64x256xf32, #tpu.memory_space<vmem>>, vector<1x64x256xf32>,
    %25 = tpu.transpose %19, [1, 0] : vector<128x256xf32> -> vector<256x128xf32>
    %26 = arith.truncf %25 : vector<256x128xf32> to vector<256x128xbf16>
    %c0_15 = arith.constant 0 : index
    %c0_16 = arith.constant 0 : index
    %c0_17 = arith.constant 0 : index
    %27 = vector.load %arg7[%c0_15, %c0_16, %c0_17] : memref<1x256x128xbf16, #tpu.memory_space<vmem>>, vector<1x256x128xbf16>
    %28 = vector.shape_cast %27 : vector<1x256x128xbf16> to vector<256x128xbf16>
    %29 = vector.shape_cast %26 : vector<256x128xbf16> to vector<1x256x128xbf16>
    tpu.vector_store %arg7[%c0_15, %c0_16, %c0_17], %29 {strides = array<i32>} : memref<1x256x128xbf16, #tpu.memory_space<vmem>>, vector<1x256x128xbf16>,
    %30 = arith.subf %21, %1 : vector<64x256xf32>
    %31 = arith.mulf %30, %30 : vector<64x256xf32>
    %cst_18 = arith.constant dense<0.000000e+00> : vector<64xf32>
    %32 = vector.multi_reduction <add>, %31, %cst_18 [1] : vector<64x256xf32> to vector<64xf32>
    %33 = vector.shape_cast %32 : vector<64xf32> to vector<64x1xf32>
    %cst_19 = arith.constant dense<0.000000e+00> : vector<1xf32>
    %34 = vector.multi_reduction <add>, %33, %cst_19 [0] : vector<64x1xf32> to vector<1xf32>
    %35 = vector.shape_cast %34 : vector<1xf32> to vector<1x1xf32>
    %36 = vector.shape_cast %35 : vector<1x1xf32> to vector<1x1x1x1xf32>
    %c0_20 = arith.constant 0 : index
    %c0_21 = arith.constant 0 : index
    %c0_22 = arith.constant 0 : index
    %c0_23 = arith.constant 0 : index
    %37 = vector.load %arg8[%c0_20, %c0_21, %c0_22, %c0_23] : memref<1x1x1x1xf32, #tpu.memory_space<vmem>>, vector<1x1x1x1xf32>
    tpu.vector_store %arg8[%c0_20, %c0_21, %c0_22, %c0_23], %36 {strides = array<i32>} : memref<1x1x1x1xf32, #tpu.memory_space<vmem>>, vector<1x1x1x1xf32>,
    %cst_24 = arith.constant dense<0.000000e+00> : vector<128xf32>
    %38 = vector.multi_reduction <add>, %19, %cst_24 [1] : vector<128x256xf32> to vector<128xf32>
    %39 = vector.shape_cast %38 : vector<128xf32> to vector<128x1xf32>
    %40 = vector.shape_cast %39 : vector<128x1xf32> to vector<1x1x128x1xf32>
    %c0_25 = arith.constant 0 : index
    %c0_26 = arith.constant 0 : index
    %c0_27 = arith.constant 0 : index
    %c0_28 = arith.constant 0 : index
    %41 = vector.load %arg9[%c0_25, %c0_26, %c0_27, %c0_28] : memref<1x1x128x1xf32, #tpu.memory_space<vmem>>, vector<1x1x128x1xf32>
    tpu.vector_store %arg9[%c0_25, %c0_26, %c0_27, %c0_28], %40 {strides = array<i32>} : memref<1x1x128x1xf32, #tpu.memory_space<vmem>>, vector<1x1x128x1xf32>,
    return
  }
  func.func @transform_0(%arg0: i32, %arg1: i32) -> (i32, i32, i32) {
    %c0_i32 = arith.constant 0 : i32
    %c0_i32_0 = arith.constant 0 : i32
    return %arg0, %c0_i32, %arg1 : i32, i32, i32
  }
  func.func @transform_1(%arg0: i32, %arg1: i32) -> (i32, i32) {
    %c0_i32 = arith.constant 0 : i32
    %c0_i32_0 = arith.constant 0 : i32
    %c0_i32_1 = arith.constant 0 : i32
    return %c0_i32, %c0_i32_0 : i32, i32
  }
  func.func @transform_2(%arg0: i32, %arg1: i32) -> (i32, i32) {
    %c0_i32 = arith.constant 0 : i32
    %c0_i32_0 = arith.constant 0 : i32
    %c0_i32_1 = arith.constant 0 : i32
    return %c0_i32, %c0_i32_0 : i32, i32
  }
  func.func @transform_3(%arg0: i32, %arg1: i32) -> (i32, i32) {
    %c0_i32 = arith.constant 0 : i32
    %c0_i32_0 = arith.constant 0 : i32
    %c0_i32_1 = arith.constant 0 : i32
    return %c0_i32, %c0_i32_0 : i32, i32
  }
  func.func @transform_4(%arg0: i32, %arg1: i32) -> (i32, i32, i32) {
    %c0_i32 = arith.constant 0 : i32
    %c0_i32_0 = arith.constant 0 : i32
    return %arg0, %c0_i32, %arg1 : i32, i32, i32
  }
  func.func @transform_5(%arg0: i32, %arg1: i32) -> (i32, i32, i32) {
    %c0_i32 = arith.constant 0 : i32
    %c0_i32_0 = arith.constant 0 : i32
    return %arg0, %arg1, %c0_i32 : i32, i32, i32
  }
  func.func @transform_6(%arg0: i32, %arg1: i32) -> (i32, i32, i32, i32) {
    %c0_i32 = arith.constant 0 : i32
    %c0_i32_0 = arith.constant 0 : i32
    %c0_i32_1 = arith.constant 0 : i32
    return %arg0, %arg1, %c0_i32, %c0_i32_0 : i32, i32, i32, i32
  }
  func.func @transform_7(%arg0: i32, %arg1: i32) -> (i32, i32, i32, i32) {
    %c0_i32 = arith.constant 0 : i32
    %c0_i32_0 = arith.constant 0 : i32
    %c0_i32_1 = arith.constant 0 : i32
    return %arg0, %arg1, %c0_i32, %c0_i32_0 : i32, i32, i32, i32
  }
}

</mosaic_0001>

<bundles_post_ra>
// kernel: vector_quantizer_forward.1
= control target key start
LH: loop header
LB: loop body
LE: loop exit
PB: predicated region body
PF: predicated region fallthrough
CT: control target
= control target key end

     0   :  { %13 = vsyncpa [#allocation3], 0  ;;  %s3095_s0 = inlined_call_operand.vmem [shape: f32[2,64,256], index: 0, kind: input, shape index: {}]   ;;  %s3096_s1 = inlined_call_operand.vmem [shape: f32[128,64], index: 1, kind: input, shape index: {}]   ;;  %s3097_s2 = inlined_call_operand.vmem [shape: bf16[64,128], index: 2, kind: input, shape index: {}]   ;;  %s3098_s3 = inlined_call_operand.vmem [shape: f32[128,1], index: 3, kind: input, shape index: {}]   ;;  %s3099_s4 = inlined_call_operand.vmem [shape: f32[2,64,256], index: 4, kind: output, shape index: {0}]   ;;  %s3100_s5 = inlined_call_operand.hbm [shape: bf16[2,256,128], index: 5, kind: output, shape index: {1}]   ;;  %s3101_s6 = inlined_call_operand.vmem [shape: f32[2,1,1,1], index: 6, kind: output, shape index: {2}]   ;;  %s3102_s7 = inlined_call_operand.vmem [shape: f32[2,1,128,1], index: 7, kind: output, shape index: {3}]  }
   0x1   :  { %15 = vsyncpa [#allocation3 + $0x1], 0  ;;  %s2301_s24 = smov 0   ;;  %s2303_s25 = smov 0  }
   0x2   :  { %s2305_s26 = smov 0   ;;  %s2307_s27 = smov 0  }
   0x3   :  { %s2309_s28 = smov 0   ;;  %s2311_s29 = smov 0  }
   0x4 LB: > { %s1717_s30 = sadd.s32 4294967295, %s2254_s29   ;;  %s1718_s8 = sadd.s32 4294967294, %s2254_s29   ;;  %s2254_s29 = sphi %s2311_s29, %s21_s29   ;;  %s2250_s28 = sphi %s2309_s28, %s3109_s28   ;;  %s2246_s27 = sphi %s2307_s27, %s3108_s27   ;;  %s2242_s26 = sphi %s2305_s26, %s3107_s26   ;;  %s2238_s25 = sphi %s2303_s25, %s3106_s25   ;;  %s2234_s24 = sphi %s2301_s24, %s3105_s24  }
   0x5   : > { %s33_s9 = sadd.s32 1, %s2250_s28  ;;  %s161_s10 = sadd.s32 1, %s2242_s26 }
   0x6   : > { %p35_p0 = scmp.ge.s32.totalorder %s33_s9, 2  ;;  %p171_p1 = scmp.ne.s32.totalorder %s2242_s26, %s2238_s25 }
   0x7   : > { %p172_p2 = scmp.eq.s32.totalorder %s1717_s30, 1  ;;  %p177_p3 = scmp.ne.s32.totalorder %s2238_s25, %s2234_s24 }
   0x8   : > { %s3111_s9 = smov (%p35_p0, %s33_s9), 0  ;;  %p178_p5 = scmp.eq.s32.totalorder %s1718_s8, 1 }
   0x9   : > { %p2341_p4 = por %p172_p2, %p171_p1  ;;  %s156_s12 = ssub.s32 %s2250_s28, %s3111_s9 }
   0xa   : > { %p1721_p6 = scmp.ge.s32.totalorder %s2254_s29, 1  ;;  %p159_p7 = scmp.eq.s32.totalorder %s156_s12, 0 }
   0xb   : > { %p2348_p8 = por %p178_p5, %p177_p3  ;;  %p274_p9 = scmp.lt.s32.totalorder %s2254_s29, 3 }
   0xc   : > { %s2354_s14 = scalar_select %p159_p7, %s2242_s26, %s161_s10  }
   0xd   : > { %p275_p10 = pnand %p1721_p6, %p274_p9 }
   0xe   : > { %p335_p11 = scmp.lt.s32.totalorder (!%p275_p10), %s2246_s27, 1  ;;  %s312_s22 = sand.u32 (!%p275_p10), 1, %s2238_s25  }
   0xf   : > { %278 = sbr.rel (%p275_p10) target bundleno = 819 (0x333), region = 36  ;;  %s1722_s23 = sshll.u32 (!%p275_p10), %s312_s22, 7 }
  0x10   : > { %s2937_s30 = scalar_lea.vmem (!%p275_p10), [#allocation2], %s1722_s23  ;;  %s3038_s10 = scalar_lea.sflag (!%p275_p10), [#allocation3], %s312_s22 }
  0x11   : > { %s1528_s21 = sshll.u32 (!%p275_p10), %s2937_s30, 4  ;;  %s3034_s21 = int_to_ptr.vmem [resolvable:$true] %s1528_s21 }
  0x12   : > { %s2178_s17 = scalar_lea.vmem (!%p275_p10), %s3034_s21, 2048 }
  0x13   : > { %p2179_p12 = scmp.ne.s32.totalorder (!%p275_p10), %s3034_s21, %s2178_s17 }
  0x14   : > { %v2256_v0 = vmov 0.0   ;;  %s2359_s15 = scalar_select %p335_p11, %s2246_s27, 1  ;;  %v2257_v1 = vmov 0   ;;  %v411_v2 = vld [vmem:[%s3098_s3] sm:$0xff]  ;;  %v412_v7 = vld [vmem:[%s3098_s3 + $0x8] sm:$0xff]  ;;  %v413_v12 = vld [vmem:[%s3098_s3 + $0x10] sm:$0xff] }
  0x15   : > { %540 = vmatprep.mubr.f32.mxu0 %v2256_v0  ;;  %1976 = vset.pattern.permute.xlu0 %v2257_v1  ;;  %v415_v14 = vld [vmem:[%s3098_s3 + $0x20] sm:$0xff]  ;;  %v414_v16 = vld [vmem:[%s3098_s3 + $0x18] sm:$0xff]  ;;  %v416_v21 = vld [vmem:[%s3098_s3 + $0x28] sm:$0xff]  ;;  %vm427_vm0 = vcmask 523264   ;;  %vm1467_vm1 = vcmask 7168   ;;  %p2180_p13 = pnand %p2179_p12, %p2341_p4 }
  0x16   : > { %1977 = vset.pattern.permute.xlu1 %v2257_v1  ;;  %1067 = vmatprep.mubr.bf16.mxu1 %v2257_v1  ;;  %s2365_s16 = sshll.u32 %s2359_s15, 7  ;;  %v417_v22 = vld [vmem:[%s3098_s3 + $0x30] sm:$0xff]  ;;  %v419_v25 = vld [vmem:[%s3098_s3 + $0x40] sm:$0xff]  ;;  %v418_v27 = vld [vmem:[%s3098_s3 + $0x38] sm:$0xff] }
  0x17   : > { %s2371_s19 = scalar_lea.vmem %s3095_s0, %s2365_s16  ;;  %671 = vperm.xlu0 %1976, %v411_v2   ;;  %681 = vperm.xlu1 %1977, %v413_v12   ;;  %v387_v26 = vld [vmem:[%s3096_s1] sm:$0xff]  ;;  %v421_v28 = vld [vmem:[%s3098_s3 + $0x50] sm:$0xff]  ;;  %v388_v29 = vld [vmem:[%s3096_s1 + $0x8] sm:$0xff]  ;;  %s2945_s12 = scalar_lea.vmem %s3102_s7, %s2365_s16 }
  0x18   : > { %v386_v3 = vld [vmem:[%s2371_s19 + $0x78] sm:$0xff]  ;;  %v385_v4 = vld [vmem:[%s2371_s19 + $0x70] sm:$0xff]  ;;  %v384_v5 = vld [vmem:[%s2371_s19 + $0x68] sm:$0xff]  ;;  %s2987_s20 = scalar_lea.vmem %s3099_s4, %s2365_s16  ;;  %s1821_s16 = sshll.u32 %s2246_s27, 11 }
  0x19   : > { %492 = vmatprep.subr.mxu0 %v386_v3  ;;  %v383_v6 = vld [vmem:[%s2371_s19 + $0x60] sm:$0xff]  ;;  %v382_v8 = vld [vmem:[%s2371_s19 + $0x58] sm:$0xff]  ;;  %v381_v9 = vld [vmem:[%s2371_s19 + $0x50] sm:$0xff]  ;;  %s3032_s8 = scalar_lea.hbm %s3100_s5, %s1821_s16  ;;  %p2181_p0 = pneg %p2180_p13 }
  0x1a   : > { %493 = vmatpush1.msra.mxu0 %v385_v4  ;;  %v380_v10 = vld [vmem:[%s2371_s19 + $0x48] sm:$0xff]  ;;  %v379_v11 = vld [vmem:[%s2371_s19 + $0x40] sm:$0xff]  ;;  %v378_v13 = vld [vmem:[%s2371_s19 + $0x38] sm:$0xff]  ;;  %s2258_s27 = smov [#allocation2]  }
  0x1b   : > { %494 = vmatprep.subr.mxu0 %v384_v5  ;;  %676 = vperm.xlu0 %1976, %v412_v7   ;;  %v377_v15 = vld [vmem:[%s2371_s19 + $0x30] sm:$0xff]  ;;  %v376_v17 = vld [vmem:[%s2371_s19 + $0x28] sm:$0xff]  ;;  %v375_v18 = vld [vmem:[%s2371_s19 + $0x20] sm:$0xff] }
  0x1c   : > { %495 = vmatpush1.msra.mxu0 %v383_v6  ;;  %v374_v19 = vld [vmem:[%s2371_s19 + $0x18] sm:$0xff]  ;;  %v373_v20 = vld [vmem:[%s2371_s19 + $0x10] sm:$0xff]  ;;  %686 = vperm.xlu1 %1977, %v414_v16   ;;  %v372_v23 = vld [vmem:[%s2371_s19 + $0x8] sm:$0xff] }
  0x1d   : > { %496 = vmatprep.subr.mxu0 %v382_v8  ;;  %v371_v24 = vld [vmem:[%s2371_s19] sm:$0xff]  ;;  %v420_v30 = vld [vmem:[%s3098_s3 + $0x48] sm:$0xff]  ;;  %v389_v32 = vld [vmem:[%s3096_s1 + $0x10] sm:$0xff] }
  0x1e   : > { %497 = vmatpush1.msra.mxu0 %v381_v9  ;;  %v423_v31 = vld [vmem:[%s3098_s3 + $0x60] sm:$0xff]  ;;  %v422_v33 = vld [vmem:[%s3098_s3 + $0x58] sm:$0xff]  ;;  %v425_v34 = vld [vmem:[%s3098_s3 + $0x70] sm:$0xff] }
  0x1f   : > { %498 = vmatprep.subr.mxu0 %v380_v10  ;;  %691 = vperm.xlu0 %1976, %v415_v14   ;;  %v390_v35 = vld [vmem:[%s3096_s1 + $0x18] sm:$0xff]  ;;  %v424_v36 = vld [vmem:[%s3098_s3 + $0x68] sm:$0xff]  ;;  %v391_v37 = vld [vmem:[%s3096_s1 + $0x20] sm:$0xff] }
  0x20   : > { %499 = vmatpush1.msra.mxu0 %v379_v11  ;;  %696 = vperm.xlu1 %1977, %v416_v21   ;;  %v426_v38 = vld [vmem:[%s3098_s3 + $0x78] sm:$0xff]  ;;  %v392_v39 = vld [vmem:[%s3096_s1 + $0x28] sm:$0xff]  ;;  %v393_v40 = vld [vmem:[%s3096_s1 + $0x30] sm:$0xff] }
  0x21   : > { %500 = vmatprep.subr.mxu0 %v378_v13  ;;  %v394_v41 = vld [vmem:[%s3096_s1 + $0x38] sm:$0xff]  ;;  %v395_v42 = vld [vmem:[%s3096_s1 + $0x40] sm:$0xff]  ;;  %v396_v43 = vld [vmem:[%s3096_s1 + $0x48] sm:$0xff] }
  0x22   : > { %501 = vmatpush1.msra.mxu0 %v377_v15  ;;  %v397_v44 = vld [vmem:[%s3096_s1 + $0x50] sm:$0xff]  ;;  %v398_v45 = vld [vmem:[%s3096_s1 + $0x58] sm:$0xff]  ;;  %v399_v46 = vld [vmem:[%s3096_s1 + $0x60] sm:$0xff] }
  0x23   : > { %502 = vmatprep.subr.mxu0 %v376_v17  ;;  %701 = vperm.xlu0 %1976, %v417_v22   ;;  %v400_v47 = vld [vmem:[%s3096_s1 + $0x68] sm:$0xff]  ;;  %v401_v48 = vld [vmem:[%s3096_s1 + $0x70] sm:$0xff]  ;;  %v402_v49 = vld [vmem:[%s3096_s1 + $0x78] sm:$0xff] }
  0x24   : > { %503 = vmatpush1.msra.mxu0 %v375_v18  ;;  %706 = vperm.xlu1 %1977, %v418_v27  }
  0x25   : > { %504 = vmatprep.subr.mxu0 %v374_v19 }
  0x26   : > { %505 = vmatpush1.msra.mxu0 %v373_v20 }
  0x27   : > { %506 = vmatprep.subr.mxu0 %v372_v23  ;;  %711 = vperm.xlu0 %1976, %v419_v25  }
  0x28   : > { %507 = vmatpush1.msra.mxu0 %v371_v24  ;;  %716 = vperm.xlu1 %1977, %v420_v30  }
  0x29   : > { %1729 = vmatmul.mubr.msk.f32.vlgmr.msra.gmra.mxu0 %vm427_vm0, %v387_v26 }
  0x2a   : > { %546 = vmatprep.mubr.f32.mxu0 %v2256_v0 }
  0x2b   : > { %721 = vperm.xlu0 %1976, %v421_v28  }
  0x2c   : > { %726 = vperm.xlu1 %1977, %v422_v33  }
  0x2d   : > { %1730 = vmatmul.mubr.msk.f32.gmra.mxu0 %vm427_vm0, %v388_v29 }
  0x2e   : > { %552 = vmatprep.mubr.f32.mxu0 %v2256_v0 }
  0x2f   : > { %731 = vperm.xlu0 %1976, %v423_v31  }
  0x30   : > { %736 = vperm.xlu1 %1977, %v424_v36  }
  0x31   : > { %1731 = vmatmul.mubr.msk.f32.gmra.mxu0 %vm427_vm0, %v389_v32 }
  0x32   : > { %558 = vmatprep.mubr.f32.mxu0 %v2256_v0 }
  0x33   : > { %741 = vperm.xlu0 %1976, %v425_v34  }
  0x34   : > { %746 = vperm.xlu1 %1977, %v426_v38  }
  0x35   : > { %1732 = vmatmul.mubr.msk.f32.gmra.mxu0 %vm427_vm0, %v390_v35 }
  0x36   : > { %564 = vmatprep.mubr.f32.mxu0 %v2256_v0 }
  0x39   : > { %1733 = vmatmul.mubr.msk.f32.gmra.mxu0 %vm427_vm0, %v391_v37 }
  0x3a   : > { %570 = vmatprep.mubr.f32.mxu0 %v2256_v0 }
  0x3d   : > { %1734 = vmatmul.mubr.msk.f32.gmra.mxu0 %vm427_vm0, %v392_v39 }
  0x3e   : > { %576 = vmatprep.mubr.f32.mxu0 %v2256_v0 }
  0x41   : > { %1735 = vmatmul.mubr.msk.f32.gmra.mxu0 %vm427_vm0, %v393_v40 }
  0x42   : > { %582 = vmatprep.mubr.f32.mxu0 %v2256_v0 }
  0x45   : > { %1736 = vmatmul.mubr.msk.f32.gmra.mxu0 %vm427_vm0, %v394_v41 }
  0x46   : > { %588 = vmatprep.mubr.f32.mxu0 %v2256_v0 }
  0x49   : > { %1737 = vmatmul.mubr.msk.f32.gmra.mxu0 %vm427_vm0, %v395_v42 }
  0x4a   : > { %594 = vmatprep.mubr.f32.mxu0 %v2256_v0 }
  0x4d   : > { %1738 = vmatmul.mubr.msk.f32.gmra.mxu0 %vm427_vm0, %v396_v43 }
  0x4e   : > { %600 = vmatprep.mubr.f32.mxu0 %v2256_v0 }
  0x51   : > { %1739 = vmatmul.mubr.msk.f32.gmra.mxu0 %vm427_vm0, %v397_v44 }
  0x52   : > { %606 = vmatprep.mubr.f32.mxu0 %v2256_v0 }
  0x55   : > { %1740 = vmatmul.mubr.msk.f32.gmra.mxu0 %vm427_vm0, %v398_v45 }
  0x56   : > { %612 = vmatprep.mubr.f32.mxu0 %v2256_v0 }
  0x59   : > { %1741 = vmatmul.mubr.msk.f32.gmra.mxu0 %vm427_vm0, %v399_v46 }
  0x5a   : > { %618 = vmatprep.mubr.f32.mxu0 %v2256_v0 }
  0x5d   : > { %1742 = vmatmul.mubr.msk.f32.gmra.mxu0 %vm427_vm0, %v400_v47 }
  0x5e   : > { %624 = vmatprep.mubr.f32.mxu0 %v2256_v0 }
  0x61   : > { %1743 = vmatmul.mubr.msk.f32.gmra.mxu0 %vm427_vm0, %v401_v48 }
  0x62   : > { %630 = vmatprep.mubr.f32.mxu0 %v2256_v0 }
  0x65   : > { %1744 = vmatmul.mubr.msk.f32.gmra.mxu0 %vm427_vm0, %v402_v49 }
  0x92   : > { %v672_v60 = vpop.permute.xlu0 %671  ;;  %v682_v61 = vpop.permute.xlu1 %681 }
  0x96   : > { %v677_v2 = vpop.permute.xlu0 %676 }
  0x97   : > { %v687_v3 = vpop.permute.xlu1 %686 }
  0x9a   : > { %v692_v6 = vpop.permute.xlu0 %691 }
  0x9b   : > { %v697_v8 = vpop.permute.xlu1 %696 }
  0x9e   : > { %v702_v11 = vpop.permute.xlu0 %701 }
  0x9f   : > { %v707_v13 = vpop.permute.xlu1 %706 }
  0xa2   : > { %v712_v22 = vpop.permute.xlu0 %711 }
  0xa3   : > { %v717_v30 = vpop.permute.xlu1 %716 }
  0xa6   : > { %v722_v48 = vpop.permute.xlu0 %721 }
  0xe9   : > { %v542_v50 = vpop.f32.mrf.mxu0 }
  0xea   : > { %v637_v18 = vmul.f32 2.0, %v542_v50 }
  0xeb   : > { %v544_v51 = vpop.f32.mrf.mxu0 }
  0xec   : > { %v638_v24 = vmul.f32 2.0, %v544_v51  ;;  %v2520_v35 = vsub.f32 %v637_v18, %v672_v60 }
  0xed   : > { %v548_v52 = vpop.f32.mrf.mxu0 }
  0xee   : > { %v639_v26 = vmul.f32 2.0, %v548_v52  ;;  %v2528_v40 = vsub.f32 %v638_v24, %v672_v60 }
  0xef   : > { %v550_v53 = vpop.f32.mrf.mxu0 }
  0xf0   : > { %v640_v27 = vmul.f32 2.0, %v550_v53  ;;  %v2532_v44 = vsub.f32 %v639_v26, %v677_v2 }
  0xf1   : > { %v554_v54 = vpop.f32.mrf.mxu0 }
  0xf2   : > { %v641_v15 = vmul.f32 2.0, %v554_v54  ;;  %v2534_v45 = vsub.f32 %v640_v27, %v677_v2 }
  0xf3   : > { %v556_v55 = vpop.f32.mrf.mxu0 }
  0xf4   : > { %v642_v17 = vmul.f32 2.0, %v556_v55  ;;  %v2516_v28 = vsub.f32 %v641_v15, %v682_v61  ;;  %v732_v15 = vpop.permute.xlu0 %731 }
  0xf5   : > { %v560_v56 = vpop.f32.mrf.mxu0 }
  0xf6   : > { %v643_v19 = vmul.f32 2.0, %v560_v56  ;;  %v2518_v32 = vsub.f32 %v642_v17, %v682_v61  ;;  %v781_v46 = vmax.f32 %v2520_v35, %v2516_v28 }
  0xf7   : > { %v562_v57 = vpop.f32.mrf.mxu0 }
  0xf8   : > { %v644_v20 = vmul.f32 2.0, %v562_v57  ;;  %v2522_v36 = vsub.f32 %v643_v19, %v687_v3  ;;  %v802_v50 = vmax.f32 %v2528_v40, %v2518_v32  ;;  %v727_v57 = vpop.permute.xlu1 %726 }
  0xf9   : > { %v566_v58 = vpop.f32.mrf.mxu0 }
  0xfa   : > { %v645_v21 = vmul.f32 2.0, %v566_v58  ;;  %v2524_v37 = vsub.f32 %v644_v20, %v687_v3  ;;  %v782_v54 = vmax.f32 %v2532_v44, %v2522_v36 }
  0xfb   : > { %v568_v59 = vpop.f32.mrf.mxu0 }
  0xfc   : > { %v646_v25 = vmul.f32 2.0, %v568_v59  ;;  %v2526_v38 = vsub.f32 %v645_v21, %v692_v6  ;;  %v803_v55 = vmax.f32 %v2534_v45, %v2524_v37  ;;  %v737_v21 = vpop.permute.xlu1 %736 }
  0xfd   : > { %v572_v62 = vpop.f32.mrf.mxu0 }
  0xfe   : > { %v647_v29 = vmul.f32 2.0, %v572_v62  ;;  %v2530_v41 = vsub.f32 %v646_v25, %v692_v6  ;;  %v783_v56 = vmax.f32 %v781_v46, %v2526_v38 }
  0xff   : > { %v574_v63 = vpop.f32.mrf.mxu0 }
 0x100   : > { %v648_v33 = vmul.f32 2.0, %v574_v63  ;;  %v2538_v47 = vsub.f32 %v647_v29, %v697_v8  ;;  %v804_v60 = vmax.f32 %v802_v50, %v2530_v41 }
 0x101   : > { %v578_v0 = vpop.f32.mrf.mxu0 }
 0x102   : > { %v649_v34 = vmul.f32 2.0, %v578_v0  ;;  %v2542_v51 = vsub.f32 %v648_v33, %v697_v8  ;;  %v784_v0 = vmax.f32 %v782_v54, %v2538_v47 }
 0x103   : > { %v580_v4 = vpop.f32.mrf.mxu0 }
 0x104   : > { %v650_v42 = vmul.f32 2.0, %v580_v4  ;;  %v2544_v52 = vsub.f32 %v649_v34, %v702_v11  ;;  %v805_v6 = vmax.f32 %v803_v55, %v2542_v51 }
 0x105   : > { %v584_v5 = vpop.f32.mrf.mxu0 }
 0x106   : > { %v651_v43 = vmul.f32 2.0, %v584_v5  ;;  %v2552_v61 = vsub.f32 %v650_v42, %v702_v11 }
 0x107   : > { %v586_v7 = vpop.f32.mrf.mxu0 }
 0x108   : > { %v652_v53 = vmul.f32 2.0, %v586_v7  ;;  %v2554_v62 = vsub.f32 %v651_v43, %v707_v13  ;;  %v785_v7 = vmax.f32 %v783_v56, %v2544_v52  ;;  %v806_v20 = vmax.f32 %v804_v60, %v2552_v61 }
 0x109   : > { %v590_v9 = vpop.f32.mrf.mxu0 }
 0x10a   : > { %v653_v58 = vmul.f32 2.0, %v590_v9  ;;  %v2559_v8 = vsub.f32 %v652_v53, %v707_v13  ;;  %v742_v53 = vpop.permute.xlu0 %741 }
 0x10b   : > { %v592_v10 = vpop.f32.mrf.mxu0 }
 0x10c   : > { %v654_v2 = vmul.f32 2.0, %v592_v10  ;;  %v2561_v17 = vsub.f32 %v653_v58, %v712_v22  ;;  %v786_v10 = vmax.f32 %v784_v0, %v2554_v62 }
 0x10d   : > { %v596_v12 = vpop.f32.mrf.mxu0 }
 0x10e   : > { %v655_v63 = vmul.f32 2.0, %v596_v12  ;;  %v2567_v24 = vsub.f32 %v654_v2, %v712_v22  ;;  %v787_v34 = vmax.f32 %v785_v7, %v2561_v17 }
 0x10f   : > { %v598_v14 = vpop.f32.mrf.mxu0 }
 0x110   : > { %v656_v3 = vmul.f32 2.0, %v598_v14  ;;  %v2565_v14 = vsub.f32 %v655_v63, %v717_v30  ;;  %v808_v50 = vmax.f32 %v806_v20, %v2567_v24  ;;  %v747_v63 = vpop.permute.xlu1 %746 }
 0x111   : > { %v602_v16 = vpop.f32.mrf.mxu0 }
 0x112   : > { %v657_v4 = vmul.f32 2.0, %v602_v16  ;;  %v2569_v13 = vsub.f32 %v656_v3, %v717_v30  ;;  %v788_v43 = vmax.f32 %v786_v10, %v2565_v14 }
 0x113   : > { %v604_v23 = vpop.f32.mrf.mxu0 }
 0x114   : > { %v658_v11 = vmul.f32 2.0, %v604_v23  ;;  %v2571_v25 = vsub.f32 %v657_v4, %v722_v48  ;;  %v807_v23 = vmax.f32 %v805_v6, %v2559_v8 }
 0x115   : > { %v608_v31 = vpop.f32.mrf.mxu0 }
 0x116   : > { %v659_v9 = vmul.f32 2.0, %v608_v31  ;;  %v809_v54 = vmax.f32 %v807_v23, %v2569_v13  ;;  %v789_v55 = vmax.f32 %v787_v34, %v2571_v25 }
 0x117   : > { %v610_v39 = vpop.f32.mrf.mxu0 }
 0x118   : > { %v660_v18 = vmul.f32 2.0, %v610_v39  ;;  %v2574_v29 = vsub.f32 %v659_v9, %v727_v57  ;;  %v2577_v39 = vsub.f32 %v658_v11, %v722_v48 }
 0x119   : > { %v614_v49 = vpop.f32.mrf.mxu0 }
 0x11a   : > { %v661_v19 = vmul.f32 2.0, %v614_v49  ;;  %v2579_v42 = vsub.f32 %v660_v18, %v727_v57  ;;  %v790_v57 = vmax.f32 %v788_v43, %v2574_v29  ;;  %v810_v0 = vmax.f32 %v808_v50, %v2577_v39 }
 0x11b   : > { %v616_v59 = vpop.f32.mrf.mxu0 }
 0x11c   : > { %v662_v26 = vmul.f32 2.0, %v616_v59  ;;  %v2581_v22 = vsub.f32 %v661_v19, %v732_v15  ;;  %v811_v2 = vmax.f32 %v809_v54, %v2579_v42 }
 0x11d   : > { %v620_v5 = vpop.f32.mrf.mxu0 }
 0x11e   : > { %v663_v16 = vmul.f32 2.0, %v620_v5  ;;  %v2589_v56 = vsub.f32 %v662_v26, %v732_v15  ;;  %v791_v3 = vmax.f32 %v789_v55, %v2581_v22 }
 0x11f   : > { %v622_v12 = vpop.f32.mrf.mxu0 }
 0x120   : > { %v664_v31 = vmul.f32 2.0, %v622_v12  ;;  %v2584_v46 = vsub.f32 %v663_v16, %v737_v21  ;;  %v812_v15 = vmax.f32 %v810_v0, %v2589_v56 }
 0x121   : > { %v626_v27 = vpop.f32.mrf.mxu0 }
 0x122   : > { %v665_v33 = vmul.f32 2.0, %v626_v27  ;;  %v2592_v58 = vsub.f32 %v664_v31, %v737_v21  ;;  %v792_v5 = vmax.f32 %v790_v57, %v2584_v46 }
 0x123   : > { %v628_v30 = vpop.f32.mrf.mxu0 }
 0x124   : > { %v666_v49 = vmul.f32 2.0, %v628_v30  ;;  %v2594_v59 = vsub.f32 %v665_v33, %v742_v53  ;;  %v813_v11 = vmax.f32 %v811_v2, %v2592_v58 }
 0x125   : > { %v632_v48 = vpop.f32.mrf.mxu0 }
 0x126   : > { %v667_v60 = vmul.f32 2.0, %v632_v48  ;;  %v2600_v6 = vsub.f32 %v666_v49, %v742_v53  ;;  %v793_v18 = vmax.f32 %v791_v3, %v2594_v59 }
 0x127   : > { %v634_v4 = vpop.f32.mrf.mxu0 }
 0x128   : > { %v2602_v7 = vsub.f32 %v667_v60, %v747_v63  ;;  %v668_v9 = vmul.f32 2.0, %v634_v4  ;;  %v814_v20 = vmax.f32 %v812_v15, %v2600_v6 }
 0x12a   : > { %v794_v19 = vmax.f32 %v792_v5, %v2602_v7  ;;  %v2608_v12 = vsub.f32 %v668_v9, %v747_v63 }
 0x12c   : > { %v795_v10 = vmax.f32 %v793_v18, %v794_v19  ;;  %v815_v16 = vmax.f32 %v813_v11, %v2608_v12 }
 0x12e   : > { %v796_v21 = vrot.slane %v795_v10, 4  ;;  %v816_v26 = vmax.f32 %v814_v20, %v815_v16 }
 0x130   : > { %v797_v27 = vmax.f32 %v795_v10, %v796_v21  ;;  %v817_v23 = vrot.slane %v816_v26, 4 }
 0x132   : > { %v798_v31 = vrot.slane %v797_v27, 2  ;;  %v818_v34 = vmax.f32 %v816_v26, %v817_v23 }
 0x134   : > { %v799_v33 = vmax.f32 %v797_v27, %v798_v31  ;;  %v819_v49 = vrot.slane %v818_v34, 2 }
 0x136   : > { %v800_v30 = vrot.slane %v799_v33, 1  ;;  %v820_v48 = vmax.f32 %v818_v34, %v819_v49 }
 0x138   : > { %v2612_v43 = vmax.f32 %v799_v33, %v800_v30 }
 0x13a   : > { %v823_v50 = vsub.f32 %v2520_v35, %v2612_v43  ;;  %v825_v53 = vsub.f32 %v2532_v44, %v2612_v43  ;;  %v827_v54 = vsub.f32 %v2516_v28, %v2612_v43  ;;  %v829_v55 = vsub.f32 %v2522_v36, %v2612_v43 }
 0x13b   : > { %v831_v63 = vsub.f32 %v2526_v38, %v2612_v43  ;;  %v833_v35 = vsub.f32 %v2538_v47, %v2612_v43  ;;  %v821_v44 = vrot.slane %v820_v48, 1  ;;  %v835_v28 = vsub.f32 %v2544_v52, %v2612_v43 }
 0x13c   : > { %v855_v57 = vmul.f32 1.442695, %v823_v50  ;;  %v859_v60 = vmul.f32 1.442695, %v825_v53  ;;  %v863_v0 = vmul.f32 1.442695, %v827_v54  ;;  %v837_v36 = vsub.f32 %v2554_v62, %v2612_v43 }
 0x13d   : > { %v867_v2 = vmul.f32 1.442695, %v829_v55  ;;  %v871_v3 = vmul.f32 1.442695, %v831_v63  ;;  %v875_v4 = vmul.f32 1.442695, %v833_v35  ;;  %v2630_v5 = vmax.f32 %v820_v48, %v821_v44 }
 0x13e   : > { %2094 = vpow2.f32 %v855_v57  ;;  %v839_v38 = vsub.f32 %v2561_v17, %v2612_v43  ;;  %v879_v47 = vmul.f32 1.442695, %v835_v28  ;;  %v841_v9 = vsub.f32 %v2565_v14, %v2612_v43 }
 0x13f   : > { %2096 = vpow2.f32 %v859_v60  ;;  %v883_v15 = vmul.f32 1.442695, %v837_v36  ;;  %v824_v52 = vsub.f32 %v2528_v40, %v2630_v5  ;;  %v826_v62 = vsub.f32 %v2534_v45, %v2630_v5 }
 0x140   : > { %2098 = vpow2.f32 %v863_v0  ;;  %v843_v11 = vsub.f32 %v2571_v25, %v2612_v43  ;;  %v887_v18 = vmul.f32 1.442695, %v839_v38  ;;  %v891_v19 = vmul.f32 1.442695, %v841_v9 }
 0x141   : > { %2100 = vpow2.f32 %v867_v2  ;;  %v828_v17 = vsub.f32 %v2518_v32, %v2630_v5  ;;  %v845_v14 = vsub.f32 %v2574_v29, %v2612_v43  ;;  %v857_v10 = vmul.f32 1.442695, %v824_v52 }
 0x142   : > { %2102 = vpow2.f32 %v871_v3  ;;  %v830_v45 = vsub.f32 %v2524_v37, %v2630_v5  ;;  %v861_v16 = vmul.f32 1.442695, %v826_v62  ;;  %v847_v25 = vsub.f32 %v2581_v22, %v2612_v43 }
 0x143   : > { %2104 = vpow2.f32 %v875_v4  ;;  %v895_v21 = vmul.f32 1.442695, %v843_v11  ;;  %v832_v29 = vsub.f32 %v2530_v41, %v2630_v5  ;;  %v865_v27 = vmul.f32 1.442695, %v828_v17 }
 0x144   : > { %2106 = vpow2.f32 %v879_v47  ;;  %v849_v23 = vsub.f32 %v2584_v46, %v2612_v43  ;;  %v899_v37 = vmul.f32 1.442695, %v845_v14  ;;  %v834_v33 = vsub.f32 %v2542_v51, %v2630_v5 }
 0x145   : > { %2108 = vpow2.f32 %v883_v15  ;;  %v869_v34 = vmul.f32 1.442695, %v830_v45  ;;  %v851_v30 = vsub.f32 %v2594_v59, %v2612_v43  ;;  %v903_v41 = vmul.f32 1.442695, %v847_v25 }
 0x146   : > { %2110 = vpow2.f32 %v887_v18  ;;  %v836_v46 = vsub.f32 %v2552_v61, %v2630_v5  ;;  %v873_v53 = vmul.f32 1.442695, %v832_v29  ;;  %v853_v54 = vsub.f32 %v2602_v7, %v2612_v43 }
 0x147   : > { %2112 = vpow2.f32 %v891_v19  ;;  %v907_v51 = vmul.f32 1.442695, %v849_v23  ;;  %v838_v59 = vsub.f32 %v2559_v8, %v2630_v5  ;;  %v877_v57 = vmul.f32 1.442695, %v834_v33 }
 0x148   : > { %2114 = vpow2.f32 %v857_v10  ;;  %v911_v60 = vmul.f32 1.442695, %v851_v30  ;;  %v840_v7 = vsub.f32 %v2567_v24, %v2630_v5  ;;  %v881_v43 = vmul.f32 1.442695, %v836_v46 }
 0x149   : > { %2116 = vpow2.f32 %v861_v16  ;;  %v915_v0 = vmul.f32 1.442695, %v853_v54  ;;  %v842_v8 = vsub.f32 %v2569_v13, %v2630_v5  ;;  %v885_v44 = vmul.f32 1.442695, %v838_v59 }
 0x14a   : > { %2118 = vpow2.f32 %v895_v21  ;;  %v844_v24 = vsub.f32 %v2577_v39, %v2630_v5  ;;  %v889_v36 = vmul.f32 1.442695, %v840_v7  ;;  %v846_v13 = vsub.f32 %v2579_v42, %v2630_v5 }
 0x14b   : > { %v2644_v20 = vpop.eup %2094  ;;  %2120 = vpow2.f32 %v865_v27  ;;  %v893_v9 = vmul.f32 1.442695, %v842_v8  ;;  %v848_v39 = vsub.f32 %v2589_v56, %v2630_v5  ;;  %v850_v14 = vsub.f32 %v2592_v58, %v2630_v5 }
 0x14c   : > { %v2648_v40 = vpop.eup %2096  ;;  %2122 = vpow2.f32 %v899_v37  ;;  %v897_v11 = vmul.f32 1.442695, %v844_v24  ;;  %v901_v10 = vmul.f32 1.442695, %v846_v13  ;;  %v852_v21 = vsub.f32 %v2600_v6, %v2630_v5 }
 0x14d   : > { %v919_v32 = vadd.f32 %v2648_v40, %v2644_v20  ;;  %v2656_v26 = vpop.eup %2098  ;;  %2124 = vpow2.f32 %v869_v34  ;;  %v854_v37 = vsub.f32 %v2608_v12, %v2630_v5 }
 0x14e   : > { %v2663_v22 = vpop.eup %2100  ;;  %2126 = vpow2.f32 %v903_v41  ;;  %v913_v41 = vmul.f32 1.442695, %v852_v21 }
 0x14f   : > { %v920_v31 = vadd.f32 %v2656_v26, %v919_v32  ;;  %v2670_v50 = vpop.eup %2102  ;;  %2128 = vpow2.f32 %v873_v53  ;;  %v905_v32 = vmul.f32 1.442695, %v848_v39 }
 0x150   : > { %v2677_v48 = vpop.eup %2104  ;;  %2130 = vpow2.f32 %v907_v51  ;;  %v917_v51 = vmul.f32 1.442695, %v854_v37 }
 0x151   : > { %v921_v49 = vadd.f32 %v2663_v22, %v920_v31  ;;  %v2682_v63 = vpop.eup %2106  ;;  %2132 = vpow2.f32 %v877_v57  ;;  %v909_v31 = vmul.f32 1.442695, %v850_v14 }
 0x152   : > { %v2687_v2 = vpop.eup %2108  ;;  %2134 = vpow2.f32 %v911_v60 }
 0x153   : > { %v922_v55 = vadd.f32 %v2670_v50, %v921_v49  ;;  %v2692_v3 = vpop.eup %2110  ;;  %2136 = vpow2.f32 %v881_v43 }
 0x154   : > { %v2696_v4 = vpop.eup %2112  ;;  %2138 = vpow2.f32 %v915_v0 }
 0x155   : > { %v923_v61 = vadd.f32 %v2677_v48, %v922_v55  ;;  %v2699_v47 = vpop.eup %2114  ;;  %2140 = vpow2.f32 %v885_v44 }
 0x156   : > { %v2703_v15 = vpop.eup %2116  ;;  %2142 = vpow2.f32 %v889_v36 }
 0x157   : > { %v924_v35 = vadd.f32 %v2682_v63, %v923_v61  ;;  %v2706_v62 = vpop.eup %2118  ;;  %v940_v18 = vadd.f32 %v2703_v15, %v2699_v47  ;;  %2144 = vpow2.f32 %v893_v9 }
 0x158   : > { %v2712_v19 = vpop.eup %2120  ;;  %2146 = vpow2.f32 %v897_v11 }
 0x159   : > { %v925_v28 = vadd.f32 %v2687_v2, %v924_v35  ;;  %v2715_v17 = vpop.eup %2122  ;;  %v941_v45 = vadd.f32 %v2712_v19, %v940_v18  ;;  %2148 = vpow2.f32 %v901_v10 }
 0x15a   : > { %v2720_v16 = vpop.eup %2124  ;;  %2150 = vpow2.f32 %v905_v32 }
 0x15b   : > { %v926_v38 = vadd.f32 %v2692_v3, %v925_v28  ;;  %v2723_v25 = vpop.eup %2126  ;;  %v942_v29 = vadd.f32 %v2720_v16, %v941_v45  ;;  %2152 = vpow2.f32 %v909_v31 }
 0x15c   : > { %v2728_v27 = vpop.eup %2128  ;;  %2154 = vpow2.f32 %v913_v41 }
 0x15d   : > { %v927_v52 = vadd.f32 %v2696_v4, %v926_v38  ;;  %v2731_v23 = vpop.eup %2130  ;;  %v943_v33 = vadd.f32 %v2728_v27, %v942_v29  ;;  %2156 = vpow2.f32 %v917_v51 }
 0x15e   : > { %v2736_v34 = vpop.eup %2132 }
 0x15f   : > { %v928_v42 = vadd.f32 %v2706_v62, %v927_v52  ;;  %v2135_v30 = vpop.eup %2134  ;;  %v944_v49 = vadd.f32 %v2736_v34, %v943_v33 }
 0x160   : > { %v2740_v46 = vpop.eup %2136 }
 0x161   : > { %v929_v56 = vadd.f32 %v2715_v17, %v928_v42  ;;  %v2139_v54 = vpop.eup %2138  ;;  %v945_v12 = vadd.f32 %v2740_v46, %v944_v49 }
 0x162   : > { %v2743_v5 = vpop.eup %2140 }
 0x163   : > { %v930_v58 = vadd.f32 %v2723_v25, %v929_v56  ;;  %v946_v59 = vadd.f32 %v2743_v5, %v945_v12  ;;  %v2746_v57 = vpop.eup %2142 }
 0x164   : > { %v2749_v7 = vpop.eup %2144 }
 0x165   : > { %v931_v6 = vadd.f32 %v2731_v23, %v930_v58  ;;  %v947_v61 = vadd.f32 %v2746_v57, %v946_v59  ;;  %v2147_v35 = vpop.eup %2146 }
 0x166   : > { %v2149_v28 = vpop.eup %2148 }
 0x167   : > { %v932_v53 = vadd.f32 %v2135_v30, %v931_v6  ;;  %v948_v0 = vadd.f32 %v2749_v7, %v947_v61  ;;  %v2151_v38 = vpop.eup %2150 }
 0x168   : > { %v2153_v52 = vpop.eup %2152 }
 0x169   : > { %v933_v55 = vadd.f32 %v2139_v54, %v932_v53  ;;  %v949_v44 = vadd.f32 %v2147_v35, %v948_v0  ;;  %v2155_v18 = vpop.eup %2154 }
 0x16a   : > { %v2157_v14 = vpop.eup %2156 }
 0x16b   : > { %v934_v60 = vrot.slane %v933_v55, 4  ;;  %v950_v36 = vadd.f32 %v2149_v28, %v949_v44 }
 0x16d   : > { %v935_v43 = vadd.f32 %v934_v60, %v933_v55  ;;  %v951_v9 = vadd.f32 %v2151_v38, %v950_v36 }
 0x16f   : > { %v936_v8 = vrot.slane %v935_v43, 2  ;;  %v952_v11 = vadd.f32 %v2153_v52, %v951_v9 }
 0x171   : > { %v937_v24 = vadd.f32 %v936_v8, %v935_v43  ;;  %v953_v42 = vadd.f32 %v2155_v18, %v952_v11 }
 0x173   : > { %v938_v13 = vrot.slane %v937_v24, 1  ;;  %v954_v10 = vadd.f32 %v2157_v14, %v953_v42 }
 0x175   : > { %v939_v39 = vadd.f32 %v938_v13, %v937_v24  ;;  %v955_v45 = vrot.slane %v954_v10, 4 }
 0x177   : > { %2158 = vrcp.f32 %v939_v39  ;;  %v956_v56 = vadd.f32 %v955_v45, %v954_v10 }
 0x179   : > { %v957_v21 = vrot.slane %v956_v56, 2 }
 0x17b   : > { %v958_v32 = vadd.f32 %v957_v21, %v956_v56 }
 0x17d   : > { %v959_v58 = vrot.slane %v958_v32, 1 }
 0x17f   : > { %v960_v37 = vadd.f32 %v959_v58, %v958_v32 }
 0x181   : > { %2160 = vrcp.f32 %v960_v37 }
 0x184   : > { %v2159_v29 = vpop.eup %2158 }
 0x185   : > { %v2753_v31 = vmul.f32 %v2159_v29, %v2644_v20  ;;  %v2756_v33 = vmul.f32 %v2159_v29, %v2648_v40  ;;  %v2759_v6 = vmul.f32 %v2159_v29, %v2656_v26  ;;  %v2762_v41 = vmul.f32 %v2159_v29, %v2663_v22 }
 0x186   : > { %v2765_v49 = vmul.f32 %v2159_v29, %v2692_v3  ;;  %v2768_v53 = vmul.f32 %v2159_v29, %v2696_v4  ;;  %v2771_v51 = vmul.f32 %v2159_v29, %v2670_v50  ;;  %v2774_v20 = vmul.f32 %v2159_v29, %v2682_v63 }
 0x187   : > { %v2777_v40 = vmul.f32 %v2159_v29, %v2687_v2  ;;  %v2782_v22 = vmul.f32 %v2159_v29, %v2677_v48  ;;  %v997_v3 = vpack.c.bf16 %v2762_v41, %v2759_v6  ;;  %v995_v4 = vpack.c.bf16 %v2756_v33, %v2753_v31 }
 0x188   : > { %v1003_v26 = vpack.c.bf16 %v2768_v53, %v2765_v49  ;;  %v2792_v2 = vmul.f32 %v2159_v29, %v2135_v30  ;;  %v2794_v12 = vmul.f32 %v2159_v29, %v2139_v54  ;;  %v2797_v55 = vmul.f32 %v2159_v29, %v2723_v25 }
 0x189   : > { %v1001_v50 = vpack.c.bf16 %v2777_v40, %v2774_v20  ;;  %v999_v63 = vpack.c.bf16 %v2782_v22, %v2771_v51  ;;  %v2802_v60 = vmul.f32 %v2159_v29, %v2731_v23  ;;  %v2805_v61 = vmul.f32 %v2159_v29, %v2706_v62 }
 0x18a   : > { %v1009_v59 = vpack.c.bf16 %v2794_v12, %v2792_v2  ;;  %v2808_v43 = vmul.f32 %v2159_v29, %v2715_v17 }
 0x18e   : > { %v2161_v48 = vpop.eup %2160 }
 0x18f   : > { %v2810_v30 = vmul.f32 %v2161_v48, %v2155_v18  ;;  %v2812_v54 = vmul.f32 %v2161_v48, %v2157_v14  ;;  %v2815_v25 = vmul.f32 %v2161_v48, %v2699_v47  ;;  %v2817_v0 = vmul.f32 %v2161_v48, %v2151_v38 }
 0x190   : > { %v2819_v8 = vmul.f32 %v2161_v48, %v2153_v52  ;;  %v2822_v23 = vmul.f32 %v2161_v48, %v2703_v15  ;;  %v2824_v44 = vmul.f32 %v2161_v48, %v2147_v35  ;;  %v2826_v62 = vmul.f32 %v2161_v48, %v2149_v28 }
 0x191   : > { %v1010_v17 = vpack.c.bf16 %v2812_v54, %v2810_v30  ;;  %v1978_v24 = vpack.i.bf16 %v2815_v25, %v2753_v31  ;;  %v1419_v47 = vadd.f32 %v2815_v25, %v2753_v31  ;;  %v968_v36 = vmul.f32 %v2161_v48, %v2712_v19 }
 0x192   : > { %v1008_v38 = vpack.c.bf16 %v2819_v8, %v2817_v0  ;;  %v1980_v15 = vpack.i.bf16 %v2822_v23, %v2756_v33  ;;  %v1422_v35 = vadd.f32 %v2822_v23, %v2756_v33  ;;  %v1007_v28 = vpack.c.bf16 %v2802_v60, %v2797_v55 }
 0x193   : > { %1035 = vmatprep.subr.bf16.mxu1 %v1010_v17  ;;  %1979 = vxpose.xlu0.b32.start [1/16] %v1978_v24, 128  ;;  %v1006_v13 = vpack.c.bf16 %v2826_v62, %v2824_v44  ;;  %v1982_v9 = vpack.i.bf16 %v968_v36, %v2759_v6  ;;  %v1425_v19 = vadd.f32 %v968_v36, %v2759_v6 }
 0x194   : > { %1420 = vadd.xlane.f32.xlu1 %v1419_v47  ;;  %1036 = vmatpush1.bf16.msra.mxu1 %v1009_v59  ;;  %v980_v52 = vmul.f32 %v2161_v48, %v2746_v57  ;;  %v970_v39 = vmul.f32 %v2161_v48, %v2720_v16  ;;  %v976_v11 = vmul.f32 %v2161_v48, %v2740_v46 }
 0x195   : > { %1037 = vmatprep.subr.bf16.mxu1 %v1008_v38  ;;  %v978_v18 = vmul.f32 %v2161_v48, %v2743_v5  ;;  %v972_v42 = vmul.f32 %v2161_v48, %v2728_v27  ;;  %v974_v14 = vmul.f32 %v2161_v48, %v2736_v34  ;;  %v996_v10 = vpack.c.bf16 %v2822_v23, %v2815_v25 }
 0x196   : > { %v982_v45 = vmul.f32 %v2161_v48, %v2749_v7  ;;  %v1984_v56 = vpack.i.bf16 %v970_v39, %v2762_v41  ;;  %v1428_v57 = vadd.f32 %v970_v39, %v2762_v41  ;;  %v998_v21 = vpack.c.bf16 %v970_v39, %v968_v36 }
 0x197   : > { %1981 = vxpose.xlu0.b32.cont [2/16] %v1980_v15, 128  ;;  %v1002_v16 = vpack.c.bf16 %v978_v18, %v976_v11  ;;  %v1986_v46 = vpack.i.bf16 %v972_v42, %v2771_v51  ;;  %v1431_v5 = vadd.f32 %v972_v42, %v2771_v51  ;;  %v1000_v32 = vpack.c.bf16 %v974_v14, %v972_v42 }
 0x198   : > { %1423 = vadd.xlane.f32.xlu1 %v1422_v35  ;;  %1038 = vmatpush1.bf16.msra.mxu1 %v1007_v28  ;;  %v1988_v27 = vpack.i.bf16 %v974_v14, %v2782_v22  ;;  %v1434_v34 = vadd.f32 %v974_v14, %v2782_v22  ;;  %v1990_v7 = vpack.i.bf16 %v976_v11, %v2774_v20 }
 0x199   : > { %1039 = vmatprep.subr.bf16.mxu1 %v1006_v13  ;;  %v1437_v29 = vadd.f32 %v976_v11, %v2774_v20  ;;  %v1992_v58 = vpack.i.bf16 %v978_v18, %v2777_v40  ;;  %v1443_v37 = vadd.f32 %v980_v52, %v2765_v49  ;;  %v1994_v48 = vpack.i.bf16 %v980_v52, %v2765_v49  ;;  %v2090_v49 = vld [vmem:[%s3097_s2] sm:$0xff]   ;;  %v2091_v20 = vld [vmem:[%s3097_s2 + $0x8] sm:$0xff]  }
 0x19a   : > { %v1005_v59 = vpack.c.bf16 %v2808_v43, %v2805_v61  ;;  %v1004_v25 = vpack.c.bf16 %v982_v45, %v980_v52  ;;  %v1440_v23 = vadd.f32 %v978_v18, %v2777_v40  ;;  %v2872_v17 = vadd.f32 %v2817_v0, %v2797_v55  ;;  %v2092_v40 = vld [vmem:[%s3097_s2 + $0x10] sm:$0xff]  }
 0x19b   : > { %1983 = vxpose.xlu0.b32.cont [3/16] %v1982_v9, 128  ;;  %v2876_v24 = vadd.f32 %v2819_v8, %v2802_v60  ;;  %v2880_v47 = vadd.f32 %v2810_v30, %v2792_v2  ;;  %v2884_v36 = vadd.f32 %v2812_v54, %v2794_v12  ;;  %v1446_v51 = vadd.f32 %v982_v45, %v2768_v53 }
 0x19c   : > { %1426 = vadd.xlane.f32.xlu1 %v1425_v19  ;;  %1040 = vmatpush1.bf16.msra.mxu1 %v1005_v59  ;;  %v1996_v6 = vpack.i.bf16 %v982_v45, %v2768_v53  ;;  %v1449_v41 = vadd.f32 %v2824_v44, %v2805_v61  ;;  %v1998_v31 = vpack.i.bf16 %v2824_v44, %v2805_v61 }
 0x19d   : > { %1041 = vmatprep.subr.bf16.mxu1 %v1004_v25  ;;  %v1452_v33 = vadd.f32 %v2826_v62, %v2808_v43  ;;  %v2000_v53 = vpack.i.bf16 %v2826_v62, %v2808_v43  ;;  %v2004_v22 = vpack.i.bf16 %v2819_v8, %v2802_v60 }
 0x19f   : > { %1985 = vxpose.xlu0.b32.cont [4/16] %v1984_v56, 128 }
 0x1a0   : > { %1429 = vadd.xlane.f32.xlu1 %v1428_v57  ;;  %1042 = vmatpush1.bf16.msra.mxu1 %v1003_v26  ;;  %v2002_v26 = vpack.i.bf16 %v2817_v0, %v2797_v55 }
 0x1a1   : > { %1043 = vmatprep.subr.bf16.mxu1 %v1002_v16 }
 0x1a3   : > { %1987 = vxpose.xlu0.b32.cont [5/16] %v1986_v46, 128 }
 0x1a4   : > { %1432 = vadd.xlane.f32.xlu1 %v1431_v5  ;;  %1044 = vmatpush1.bf16.msra.mxu1 %v1001_v50  ;;  %v2008_v50 = vpack.i.bf16 %v2812_v54, %v2794_v12 }
 0x1a5   : > { %1045 = vmatprep.subr.bf16.mxu1 %v1000_v32 }
 0x1a7   : > { %1989 = vxpose.xlu0.b32.cont [6/16] %v1988_v27, 128 }
 0x1a8   : > { %1435 = vadd.xlane.f32.xlu1 %v1434_v34  ;;  %1046 = vmatpush1.bf16.msra.mxu1 %v999_v63 }
 0x1a9   : > { %1047 = vmatprep.subr.bf16.mxu1 %v998_v21 }
 0x1ab   : > { %1991 = vxpose.xlu0.b32.cont [7/16] %v1990_v7, 128 }
 0x1ac   : > { %1438 = vadd.xlane.f32.xlu1 %v1437_v29  ;;  %1048 = vmatpush1.bf16.msra.mxu1 %v997_v3  ;;  %v2093_v3 = vld [vmem:[%s3097_s2 + $0x18] sm:$0xff]  }
 0x1ad   : > { %1049 = vmatprep.subr.bf16.mxu1 %v996_v10 }
 0x1af   : > { %1993 = vxpose.xlu0.b32.cont [8/16] %v1992_v58, 128 }
 0x1b0   : > { %1444 = vadd.xlane.f32.xlu1 %v1443_v37  ;;  %1050 = vmatpush1.bf16.msra.mxu1 %v995_v4  ;;  %v2006_v4 = vpack.i.bf16 %v2810_v30, %v2792_v2 }
 0x1b3   : > { %1995 = vxpose.xlu0.b32.cont [9/16] %v1994_v48, 128  ;;  %1068 = vmatmul.mubr.bf16.vlgmr.msra.gmra.mxu1 %v2090_v49 }
 0x1b4   : > { %1447 = vadd.xlane.f32.xlu1 %v1446_v51  ;;  %1077 = vmatprep.mubr.bf16.mxu1 %v2257_v1 }
 0x1b7   : > { %1997 = vxpose.xlu0.b32.cont [10/16] %v1996_v6, 128 }
 0x1b8   : > { %1450 = vadd.xlane.f32.xlu1 %v1449_v41 }
 0x1bb   : > { %1999 = vxpose.xlu0.b32.cont [11/16] %v1998_v31, 128  ;;  %1078 = vmatmul.mubr.bf16.gmra.mxu1 %v2091_v20 }
 0x1bc   : > { %1453 = vadd.xlane.f32.xlu1 %v1452_v33  ;;  %1087 = vmatprep.mubr.bf16.mxu1 %v2257_v1 }
 0x1bf   : > { %2001 = vxpose.xlu0.b32.cont [12/16] %v2000_v53, 128 }
 0x1c3   : > { %2003 = vxpose.xlu0.b32.cont [13/16] %v2002_v26, 128  ;;  %1088 = vmatmul.mubr.bf16.gmra.mxu1 %v2092_v40 }
 0x1c4   : > { %1097 = vmatprep.mubr.bf16.mxu1 %v2257_v1 }
 0x1c7   : > { %2005 = vxpose.xlu0.b32.cont [14/16] %v2004_v22, 128 }
 0x1cb   : > { %2007 = vxpose.xlu0.b32.cont [15/16] %v2006_v4, 128  ;;  %1098 = vmatmul.mubr.bf16.gmra.mxu1 %v2093_v3 }
 0x1cf   : > { %2009 = vxpose.xlu0.b32.end [16/16] %v2008_v50, 128 }
 0x1fc   : > { %1441 = vadd.xlane.f32.xlu0 %v1440_v23 }
 0x20f   : > { %v2010_v63 = vpop.trf.xlu0 }
 0x210   : > { %v2014_v1 = vunpack.i.h.bf16 %v2010_v63  ;;  %v2011_v55 = vunpack.i.l.bf16 %v2010_v63 }
 0x213   : > { %v2015_v60 = vpop.trf.xlu0 }
 0x214   : > { %v2019_v61 = vunpack.i.h.bf16 %v2015_v60  ;;  %v2016_v43 = vunpack.i.l.bf16 %v2015_v60 }
 0x216   : > { %v1825_v0 = vpack.c.bf16 %v2016_v43, %v2011_v55  ;;  %v1865_v8 = vpack.c.bf16 %v2019_v61, %v2014_v1 }
 0x217   : > { %v2020_v2 = vpop.trf.xlu0 }
 0x218   : > { %1826 = vst [vmem:[%s2937_s30] sm:$0xff] %v1825_v0   ;;  %1909 = vst [vmem:[%s2937_s30 + $0x40] sm:$0xff] %v1865_v8   ;;  %v2024_v12 = vunpack.i.h.bf16 %v2020_v2  ;;  %v2021_v30 = vunpack.i.l.bf16 %v2020_v2 }
 0x21b   : > { %v2025_v54 = vpop.trf.xlu0 }
 0x21c   : > { %v2029_v44 = vunpack.i.h.bf16 %v2025_v54  ;;  %v2026_v62 = vunpack.i.l.bf16 %v2025_v54 }
 0x21d   : > { %v1421_v38 = vpop.xlane.xlu1 %1420 }
 0x21e   : > { %1468 = vst.msk [vmem:[%s2945_s12] sm:$0xff] %vm1467_vm1, %v1421_v38  ;;  %v1830_v15 = vpack.c.bf16 %v2026_v62, %v2021_v30  ;;  %v1870_v35 = vpack.c.bf16 %v2029_v44, %v2024_v12 }
 0x21f   : > { %v2030_v28 = vpop.trf.xlu0 }
 0x220   : > { %1902 = vst [vmem:[%s2937_s30 + $0x8] sm:$0xff] %v1830_v15   ;;  %1910 = vst [vmem:[%s2937_s30 + $0x48] sm:$0xff] %v1870_v35   ;;  %v2034_v9 = vunpack.i.h.bf16 %v2030_v28  ;;  %v2031_v19 = vunpack.i.l.bf16 %v2030_v28  ;;  %v2162_v35 = vld [vmem:[%s2371_s19] sm:$0xff] }
 0x221   : > { %v1424_v13 = vpop.xlane.xlu1 %1423 }
 0x222   : > { %1469 = vst.msk [vmem:[%s2945_s12 + $0x8] sm:$0xff] %vm1467_vm1, %v1424_v13 }
 0x223   : > { %v2035_v52 = vpop.trf.xlu0 }
 0x224   : > { %v2039_v39 = vunpack.i.h.bf16 %v2035_v52  ;;  %v2036_v11 = vunpack.i.l.bf16 %v2035_v52 }
 0x225   : > { %v1427_v18 = vpop.xlane.xlu1 %1426 }
 0x226   : > { %1470 = vst.msk [vmem:[%s2945_s12 + $0x10] sm:$0xff] %vm1467_vm1, %v1427_v18  ;;  %v1835_v42 = vpack.c.bf16 %v2036_v11, %v2031_v19  ;;  %v1875_v14 = vpack.c.bf16 %v2039_v39, %v2034_v9  ;;  %v2163_v9 = vld [vmem:[%s2371_s19 + $0x8] sm:$0xff]  ;;  %v2164_v18 = vld [vmem:[%s2371_s19 + $0x10] sm:$0xff] }
 0x227   : > { %v2040_v10 = vpop.trf.xlu0 }
 0x228   : > { %1903 = vst [vmem:[%s2937_s30 + $0x10] sm:$0xff] %v1835_v42   ;;  %1911 = vst [vmem:[%s2937_s30 + $0x50] sm:$0xff] %v1875_v14   ;;  %v2044_v56 = vunpack.i.h.bf16 %v2040_v10  ;;  %v2041_v57 = vunpack.i.l.bf16 %v2040_v10  ;;  %v2165_v10 = vld [vmem:[%s2371_s19 + $0x18] sm:$0xff] }
 0x229   : > { %v1430_v45 = vpop.xlane.xlu1 %1429 }
 0x22a   : > { %1471 = vst.msk [vmem:[%s2945_s12 + $0x18] sm:$0xff] %vm1467_vm1, %v1430_v45 }
 0x22b   : > { %v2045_v21 = vpop.trf.xlu0 }
 0x22c   : > { %v2049_v16 = vunpack.i.h.bf16 %v2045_v21  ;;  %v2046_v46 = vunpack.i.l.bf16 %v2045_v21 }
 0x22d   : > { %v1433_v5 = vpop.xlane.xlu1 %1432 }
 0x22e   : > { %1472 = vst.msk [vmem:[%s2945_s12 + $0x20] sm:$0xff] %vm1467_vm1, %v1433_v5  ;;  %v1840_v32 = vpack.c.bf16 %v2046_v46, %v2041_v57  ;;  %v1880_v27 = vpack.c.bf16 %v2049_v16, %v2044_v56  ;;  %v2166_v46 = vld [vmem:[%s2371_s19 + $0x20] sm:$0xff] }
 0x22f   : > { %v2050_v34 = vpop.trf.xlu0 }
 0x230   : > { %1904 = vst [vmem:[%s2937_s30 + $0x18] sm:$0xff] %v1840_v32   ;;  %1912 = vst [vmem:[%s2937_s30 + $0x58] sm:$0xff] %v1880_v27   ;;  %v2054_v29 = vunpack.i.h.bf16 %v2050_v34  ;;  %v2051_v58 = vunpack.i.l.bf16 %v2050_v34  ;;  %v2167_v27 = vld [vmem:[%s2371_s19 + $0x28] sm:$0xff] }
 0x231   : > { %v1436_v7 = vpop.xlane.xlu1 %1435 }
 0x232   : > { %1473 = vst.msk [vmem:[%s2945_s12 + $0x28] sm:$0xff] %vm1467_vm1, %v1436_v7 }
 0x233   : > { %v2055_v37 = vpop.trf.xlu0 }
 0x234   : > { %v2059_v48 = vunpack.i.h.bf16 %v2055_v37  ;;  %v2056_v59 = vunpack.i.l.bf16 %v2055_v37 }
 0x235   : > { %v1439_v25 = vpop.xlane.xlu1 %1438 }
 0x236   : > { %1474 = vst.msk [vmem:[%s2945_s12 + $0x30] sm:$0xff] %vm1467_vm1, %v1439_v25  ;;  %v1845_v23 = vpack.c.bf16 %v2056_v59, %v2051_v58  ;;  %v1885_v49 = vpack.c.bf16 %v2059_v48, %v2054_v29  ;;  %v2168_v48 = vld [vmem:[%s2371_s19 + $0x30] sm:$0xff] }
 0x237   : > { %v2060_v51 = vpop.trf.xlu0 }
 0x238   : > { %1905 = vst [vmem:[%s2937_s30 + $0x20] sm:$0xff] %v1845_v23   ;;  %1913 = vst [vmem:[%s2937_s30 + $0x60] sm:$0xff] %v1885_v49   ;;  %v2064_v41 = vunpack.i.h.bf16 %v2060_v51  ;;  %v2061_v20 = vunpack.i.l.bf16 %v2060_v51  ;;  %v2169_v23 = vld [vmem:[%s2371_s19 + $0x38] sm:$0xff] }
 0x239   : > { %v1445_v6 = vpop.xlane.xlu1 %1444 }
 0x23a   : > { %1476 = vst.msk [vmem:[%s2945_s12 + $0x40] sm:$0xff] %vm1467_vm1, %v1445_v6 }
 0x23b   : > { %v2065_v31 = vpop.trf.xlu0 }
 0x23c   : > { %v2069_v33 = vunpack.i.h.bf16 %v2065_v31  ;;  %v2066_v53 = vunpack.i.l.bf16 %v2065_v31  ;;  %v2170_v31 = vld [vmem:[%s2371_s19 + $0x40] sm:$0xff] }
 0x23d   : > { %v1448_v40 = vpop.xlane.xlu1 %1447 }
 0x23e   : > { %1477 = vst.msk [vmem:[%s2945_s12 + $0x48] sm:$0xff] %vm1467_vm1, %v1448_v40  ;;  %v1850_v26 = vpack.c.bf16 %v2066_v53, %v2061_v20  ;;  %v1890_v22 = vpack.c.bf16 %v2069_v33, %v2064_v41 }
 0x23f   : > { %v2070_v3 = vpop.trf.xlu0 }
 0x240   : > { %1906 = vst [vmem:[%s2937_s30 + $0x28] sm:$0xff] %v1850_v26   ;;  %1914 = vst [vmem:[%s2937_s30 + $0x68] sm:$0xff] %v1890_v22   ;;  %v2074_v50 = vunpack.i.h.bf16 %v2070_v3  ;;  %v2071_v63 = vunpack.i.l.bf16 %v2070_v3  ;;  %v2171_v26 = vld [vmem:[%s2371_s19 + $0x48] sm:$0xff] }
 0x241   : > { %v1451_v4 = vpop.xlane.xlu1 %1450 }
 0x242   : > { %1478 = vst.msk [vmem:[%s2945_s12 + $0x50] sm:$0xff] %vm1467_vm1, %v1451_v4 }
 0x243   : > { %v2075_v1 = vpop.trf.xlu0 }
 0x244   : > { %v2079_v55 = vunpack.i.h.bf16 %v2075_v1  ;;  %v2076_v60 = vunpack.i.l.bf16 %v2075_v1  ;;  %v2172_v1 = vld [vmem:[%s2371_s19 + $0x50] sm:$0xff] }
 0x245   : > { %v1454_v61 = vpop.xlane.xlu1 %1453 }
 0x246   : > { %1479 = vst.msk [vmem:[%s2945_s12 + $0x58] sm:$0xff] %vm1467_vm1, %v1454_v61  ;;  %v1855_v43 = vpack.c.bf16 %v2076_v60, %v2071_v63  ;;  %v1895_v0 = vpack.c.bf16 %v2079_v55, %v2074_v50  ;;  %v2173_v61 = vld [vmem:[%s2371_s19 + $0x58] sm:$0xff] }
 0x247   : > { %v2080_v8 = vpop.trf.xlu0 }
 0x248   : > { %1907 = vst [vmem:[%s2937_s30 + $0x30] sm:$0xff] %v1855_v43   ;;  %1915 = vst [vmem:[%s2937_s30 + $0x70] sm:$0xff] %v1895_v0   ;;  %v2084_v2 = vunpack.i.h.bf16 %v2080_v8  ;;  %v2081_v12 = vunpack.i.l.bf16 %v2080_v8 }
 0x24b   : > { %v2085_v30 = vpop.trf.xlu0 }
 0x24c   : > { %v2089_v54 = vunpack.i.h.bf16 %v2085_v30  ;;  %v2086_v44 = vunpack.i.l.bf16 %v2085_v30  ;;  %v2174_v30 = vld [vmem:[%s2371_s19 + $0x60] sm:$0xff] }
 0x24e   : > { %v1860_v62 = vpack.c.bf16 %v2086_v44, %v2081_v12  ;;  %v1900_v38 = vpack.c.bf16 %v2089_v54, %v2084_v2 }
 0x250   : > { %1908 = vst [vmem:[%s2937_s30 + $0x38] sm:$0xff] %v1860_v62   ;;  %1916 = vst [vmem:[%s2937_s30 + $0x78] sm:$0xff] %v1900_v38   ;;  %v2175_v62 = vld [vmem:[%s2371_s19 + $0x68] sm:$0xff]  ;;  %s2182_s30 = sshll.u32 %s2258_s27, 4  ;;  %s2183_s30 = int_to_ptr.vmem [resolvable:$false] %s2182_s30 }
 0x251   : > { %s2184_s18 = scalar_lea.vmem %s2183_s30, 4096  ;;  %p2185_p1 = scmp.lt.s32.totalorder %s3034_s21, %s2183_s30 }
 0x252   : > { %p2186_p2 = scmp.lt.s32.totalorder %s2184_s18, %s2178_s17 }
 0x254   : > { %p2187_p3 = por %p2186_p2, %p2185_p1 }
 0x256   : > { %p2188_p5 = pnand %p2187_p3, %p2181_p0 }
 0x273   : > { %v1069_v15 = vpop.f32.mrf.mxu1 }
 0x274   : > { %1108 = vst [vmem:[%s2987_s20] sm:$0xff] %v1069_v15  ;;  %v1348_v28 = vsub.f32 %v1069_v15, %v2162_v35 }
 0x275   : > { %v1071_v13 = vpop.f32.mrf.mxu1 }
 0x276   : > { %1109 = vst [vmem:[%s2987_s20 + $0x8] sm:$0xff] %v1071_v13  ;;  %v1349_v19 = vsub.f32 %v1071_v13, %v2163_v9  ;;  %v1364_v39 = vmul.f32 %v1348_v28, %v1348_v28  ;;  %v2176_v9 = vld [vmem:[%s2371_s19 + $0x70] sm:$0xff] }
 0x277   : > { %v1073_v52 = vpop.f32.mrf.mxu1 }
 0x278   : > { %v1365_v11 = vmul.f32 %v1349_v19, %v1349_v19  ;;  %1110 = vst [vmem:[%s2987_s20 + $0x10] sm:$0xff] %v1073_v52  ;;  %v1350_v42 = vsub.f32 %v1073_v52, %v2164_v18 }
 0x279   : > { %v1075_v14 = vpop.f32.mrf.mxu1 }
 0x27a   : > { %1111 = vst [vmem:[%s2987_s20 + $0x18] sm:$0xff] %v1075_v14  ;;  %v1351_v45 = vsub.f32 %v1075_v14, %v2165_v10  ;;  %v1380_v56 = vadd.f32 %v1365_v11, %v1364_v39  ;;  %v1366_v21 = vmul.f32 %v1350_v42, %v1350_v42  ;;  %v2177_v39 = vld [vmem:[%s2371_s19 + $0x78] sm:$0xff] }
 0x27b   : > { %v1079_v57 = vpop.f32.mrf.mxu1 }
 0x27c   : > { %v1367_v16 = vmul.f32 %v1351_v45, %v1351_v45  ;;  %1112 = vst [vmem:[%s2987_s20 + $0x20] sm:$0xff] %v1079_v57  ;;  %v1352_v5 = vsub.f32 %v1079_v57, %v2166_v46  ;;  %1381 = vadd.xlane.f32.xlu1 %v1380_v56 }
 0x27d   : > { %v1081_v32 = vpop.f32.mrf.mxu1 }
 0x27e   : > { %1113 = vst [vmem:[%s2987_s20 + $0x28] sm:$0xff] %v1081_v32  ;;  %v1353_v34 = vsub.f32 %v1081_v32, %v2167_v27  ;;  %v1383_v7 = vadd.f32 %v1367_v16, %v1366_v21  ;;  %v1368_v58 = vmul.f32 %v1352_v5, %v1352_v5 }
 0x27f   : > { %v1083_v29 = vpop.f32.mrf.mxu1 }
 0x280   : > { %v1369_v37 = vmul.f32 %v1353_v34, %v1353_v34  ;;  %1114 = vst [vmem:[%s2987_s20 + $0x30] sm:$0xff] %v1083_v29  ;;  %v1354_v59 = vsub.f32 %v1083_v29, %v2168_v48  ;;  %1384 = vadd.xlane.f32.xlu1 %v1383_v7 }
 0x281   : > { %v1085_v25 = vpop.f32.mrf.mxu1 }
 0x282   : > { %1115 = vst [vmem:[%s2987_s20 + $0x38] sm:$0xff] %v1085_v25  ;;  %v1355_v49 = vsub.f32 %v1085_v25, %v2169_v23  ;;  %v1386_v51 = vadd.f32 %v1369_v37, %v1368_v58  ;;  %v1370_v41 = vmul.f32 %v1354_v59, %v1354_v59 }
 0x283   : > { %v1089_v6 = vpop.f32.mrf.mxu1 }
 0x284   : > { %v1371_v20 = vmul.f32 %v1355_v49, %v1355_v49  ;;  %1116 = vst [vmem:[%s2987_s20 + $0x40] sm:$0xff] %v1089_v6  ;;  %v1356_v33 = vsub.f32 %v1089_v6, %v2170_v31  ;;  %1387 = vadd.xlane.f32.xlu1 %v1386_v51 }
 0x285   : > { %v1442_v53 = vpop.xlane.xlu0 %1441  ;;  %v1091_v40 = vpop.f32.mrf.mxu1 }
 0x286   : > { %1475 = vst.msk [vmem:[%s2945_s12 + $0x38] sm:$0xff] %vm1467_vm1, %v1442_v53  ;;  %1117 = vst [vmem:[%s2987_s20 + $0x48] sm:$0xff] %v1091_v40  ;;  %v1357_v22 = vsub.f32 %v1091_v40, %v2171_v26  ;;  %v1389_v3 = vadd.f32 %v1371_v20, %v1370_v41  ;;  %v1372_v50 = vmul.f32 %v1356_v33, %v1356_v33 }
 0x287   : > { %v1093_v4 = vpop.f32.mrf.mxu1 }
 0x288   : > { %v1373_v63 = vmul.f32 %v1357_v22, %v1357_v22  ;;  %1118 = vst [vmem:[%s2987_s20 + $0x50] sm:$0xff] %v1093_v4  ;;  %v1358_v55 = vsub.f32 %v1093_v4, %v2172_v1  ;;  %1390 = vadd.xlane.f32.xlu1 %v1389_v3 }
 0x289   : > { %v1095_v60 = vpop.f32.mrf.mxu1 }
 0x28a   : > { %1119 = vst [vmem:[%s2987_s20 + $0x58] sm:$0xff] %v1095_v60  ;;  %v1359_v43 = vsub.f32 %v1095_v60, %v2173_v61  ;;  %v1392_v0 = vadd.f32 %v1373_v63, %v1372_v50  ;;  %v1374_v2 = vmul.f32 %v1358_v55, %v1358_v55 }
 0x28b   : > { %v1099_v8 = vpop.f32.mrf.mxu1 }
 0x28c   : > { %v1375_v12 = vmul.f32 %v1359_v43, %v1359_v43  ;;  %1120 = vst [vmem:[%s2987_s20 + $0x60] sm:$0xff] %v1099_v8  ;;  %v1360_v54 = vsub.f32 %v1099_v8, %v2174_v30  ;;  %1393 = vadd.xlane.f32.xlu1 %v1392_v0 }
 0x28d   : > { %v1101_v44 = vpop.f32.mrf.mxu1 }
 0x28e   : > { %1121 = vst [vmem:[%s2987_s20 + $0x68] sm:$0xff] %v1101_v44  ;;  %v1361_v38 = vsub.f32 %v1101_v44, %v2175_v62  ;;  %v1395_v15 = vadd.f32 %v1375_v12, %v1374_v2  ;;  %v1376_v28 = vmul.f32 %v1360_v54, %v1360_v54 }
 0x28f   : > { %v1103_v35 = vpop.f32.mrf.mxu1 }
 0x290   : > { %v1377_v13 = vmul.f32 %v1361_v38, %v1361_v38  ;;  %1122 = vst [vmem:[%s2987_s20 + $0x70] sm:$0xff] %v1103_v35  ;;  %v1362_v19 = vsub.f32 %v1103_v35, %v2176_v9  ;;  %1396 = vadd.xlane.f32.xlu1 %v1395_v15 }
 0x291   : > { %v1105_v52 = vpop.f32.mrf.mxu1 }
 0x292   : > { %1123 = vst [vmem:[%s2987_s20 + $0x78] sm:$0xff] %v1105_v52  ;;  %v1363_v11 = vsub.f32 %v1105_v52, %v2177_v39  ;;  %v1398_v18 = vadd.f32 %v1377_v13, %v1376_v28  ;;  %v1378_v42 = vmul.f32 %v1362_v19, %v1362_v19 }
 0x294   : > { %v1379_v14 = vmul.f32 %v1363_v11, %v1363_v11  ;;  %1399 = vadd.xlane.f32.xlu1 %v1398_v18 }
 0x296   : > { %v1401_v10 = vadd.f32 %v1379_v14, %v1378_v42 }
 0x298   : > { %1402 = vadd.xlane.f32.xlu1 %v1401_v10 }
 0x29c   : > { %1456 = vadd.xlane.f32.xlu1 %v2872_v17 }
 0x2a0   : > { %1459 = vadd.xlane.f32.xlu1 %v2876_v24 }
 0x2a4   : > { %1462 = vadd.xlane.f32.xlu1 %v2880_v47 }
 0x2a8   : > { %1465 = vadd.xlane.f32.xlu1 %v2884_v36 }
 0x2a9   : > { %2191 = shalt.err (!%p2188_p5)
}
 0x2aa   : > { %s2192_s22 = scalar_lea.hbm %s3032_s8, 2048  ;;  %s2196_s19 = scalar_lea.hbm %s3100_s5, 4096 }
 0x2ab   : > { %p2193_p6 = scmp.ne.s32.totalorder %s3032_s8, %s2192_s22  ;;  %p2197_p10 = scmp.lt.s32.totalorder %s3032_s8, %s3100_s5 }
 0x2ac   : > { %p2198_p11 = scmp.lt.s32.totalorder %s2196_s19, %s2192_s22 }
 0x2ad   : > { %p2194_p7 = pnand %p2193_p6, %p2341_p4 }
 0x2ae   : > { %p2199_p12 = por %p2198_p11, %p2197_p10 }
 0x2af   : > { %p2195_p9 = pneg %p2194_p7 }
 0x2b1   : > { %p2200_p13 = pnand %p2199_p12, %p2195_p9 }
 0x2b3   : > { %2203 = shalt.err (!%p2200_p13)
}
 0x2b4   : > { %s2259_s17 = smov 64   ;;  %s2260_s30 = smov 4   ;;  %vm1417_vm2 = vcmask 0  }
 0x2b5   : > { %1917 = dma.vmem_to_hbm [thread:$0]  (%p2341_p4), %s3034_s21, 2048, %s3032_s8, %s3038_s10, %s2259_s17, %s2259_s17, %s2260_s30  }
 0x2b6   : > { %s360_s8 = scalar_lea.vmem %s3101_s6, %s2359_s15 }
 0x305   : > { %v1382_v17 = vpop.xlane.xlu1 %1381 }
 0x309   : > { %v1385_v24 = vpop.xlane.xlu1 %1384 }
 0x30a   : > { %v1404_v56 = vadd.f32 %v1385_v24, %v1382_v17 }
 0x30d   : > { %v1388_v47 = vpop.xlane.xlu1 %1387 }
 0x30e   : > { %v1405_v57 = vadd.f32 %v1404_v56, %v1388_v47 }
 0x311   : > { %v1391_v36 = vpop.xlane.xlu1 %1390 }
 0x312   : > { %v1406_v16 = vadd.f32 %v1405_v57, %v1391_v36 }
 0x315   : > { %v1394_v45 = vpop.xlane.xlu1 %1393 }
 0x316   : > { %v1407_v46 = vadd.f32 %v1406_v16, %v1394_v45 }
 0x319   : > { %v1397_v21 = vpop.xlane.xlu1 %1396 }
 0x31a   : > { %v1408_v32 = vadd.f32 %v1407_v46, %v1397_v21 }
 0x31d   : > { %v1400_v5 = vpop.xlane.xlu1 %1399 }
 0x31e   : > { %v1409_v27 = vadd.f32 %v1408_v32, %v1400_v5 }
 0x321   : > { %v1403_v34 = vpop.xlane.xlu1 %1402 }
 0x322   : > { %v1410_v7 = vadd.f32 %v1409_v27, %v1403_v34 }
 0x324   : > { %v1411_v29 = vrot.slane %v1410_v7, 4 }
 0x325   : > { %v1457_v58 = vpop.xlane.xlu1 %1456 }
 0x326   : > { %v1412_v37 = vadd.f32 %v1411_v29, %v1410_v7  ;;  %1480 = vst.msk [vmem:[%s2945_s12 + $0x60] sm:$0xff] %vm1467_vm1, %v1457_v58 }
 0x328   : > { %v1413_v48 = vrot.slane %v1412_v37, 2 }
 0x329   : > { %v1460_v59 = vpop.xlane.xlu1 %1459 }
 0x32a   : > { %v1414_v25 = vadd.f32 %v1413_v48, %v1412_v37  ;;  %1481 = vst.msk [vmem:[%s2945_s12 + $0x68] sm:$0xff] %vm1467_vm1, %v1460_v59 }
 0x32c   : > { %v1415_v23 = vrot.slane %v1414_v25, 1 }
 0x32d   : > { %v1463_v49 = vpop.xlane.xlu1 %1462 }
 0x32e   : > { %v1416_v51 = vadd.f32 %v1415_v23, %v1414_v25  ;;  %1482 = vst.msk [vmem:[%s2945_s12 + $0x70] sm:$0xff] %vm1467_vm1, %v1463_v49 }
 0x330   : > { %1418 = vst.msk [vmem:[%s360_s8] sm:$0x1] %vm1417_vm2, %v1416_v51 }
 0x331   : > { %v1466_v6 = vpop.xlane.xlu1 %1465 }
 0x332   : > { %1483 = vst.msk [vmem:[%s2945_s12 + $0x78] sm:$0xff] %vm1467_vm1, %v1466_v6 }
 0x333 PF: > { %p1923_p4 = scmp.ge.s32.totalorder %s2254_s29, 2  ;;  %s1561_s10 = sand.u32 1, %s2234_s24  }
 0x334   : > { %s1562_s18 = scalar_lea.sflag [#allocation3], %s1561_s10 }
 0x335   : > { %p1920_p0 = pnand %p1923_p4, %p2348_p8 }
 0x337   : > { %p1921_p1 = pneg %p1920_p0 }
 0x339   : > { %2229 = dma.done.wait (%p1921_p1), %s1562_s18, 2048  }
 0x33a   : > { %2231 = vsyncadd (%p1921_p1), %s1562_s18, 4294965248  ;;  %s21_s29 = sadd.s32 1, %s2254_s29   ;;  %s3105_s24 = smov %s2238_s25 }
 0x33b   : > { %p18_p2 = scmp.ge.s32.totalorder %s21_s29, 4   ;;  %s3106_s25 = smov %s2242_s26 }
 0x33c   : > { %s3107_s26 = smov %s2354_s14  ;;  %s3108_s27 = smov %s2250_s28 }
 0x33d   : > { %s3109_s28 = smov %s3111_s9  ;;  %20 = sbr.rel (!%p18_p2) target bundleno = 4 (0x4), region = 107 }
 0x342   :  { %1588 = vsyncpa [#allocation3], 1 }
 0x343   :  { %1590 = vsyncpa [#allocation3 + $0x1], 1 }

</bundles_post_ra>
